<compile_context>
chip_gen: v7x
topology: tpu7x:2x2x1
jax: 0.10.0
libtpu: 0.0.40
codegen_flags: <defaults>
</compile_context>

<pallas_src>
import functools

import jax
import jax.numpy as jnp
import numpy as np
from jax.experimental import pallas as pl
from jax.experimental.pallas import tpu as pltpu


def _round_up(x, m):
    return (x + m - 1) // m * m


def _mdn_kernel(noise_sp_ref,                      # SMEM scalar: softplus(_noise)
                x_ref,                             # (TB, input_dim)
                w1_ref, b1_ref, w2_ref, b2_ref,    # hidden layers (resident)
                w3_ref, b3_ref, w4_ref, b4_ref,
                wm_ref, bm_ref,                    # mean head   (H, OM_PAD)
                wv_ref, bv_ref,                    # logvar head (H, OM_PAD)
                wl_ref, bl_ref,                    # logits head (H, OM_PAD)
                mean_ref, scale_ref, logits_ref):  # (TB, OM_PAD) each
    """One batch tile: full MLP + mixture-parameter post-processing."""
    h = x_ref[...]

    # hidden1..hidden4 : Linear + Swish  (x * sigmoid(x))
    for w_ref, b_ref in ((w1_ref, b1_ref), (w2_ref, b2_ref),
                         (w3_ref, b3_ref), (w4_ref, b4_ref)):
        z = jnp.dot(h, w_ref[...], preferred_element_type=jnp.float32) + b_ref[...]
        h = z * jax.nn.sigmoid(z)

    # Three small head matmuls -> lane-dense, slice-free output slabs.
    mean = jnp.dot(h, wm_ref[...], preferred_element_type=jnp.float32) + bm_ref[...]
    logvar = jnp.dot(h, wv_ref[...], preferred_element_type=jnp.float32) + bv_ref[...]
    logits = jnp.dot(h, wl_ref[...], preferred_element_type=jnp.float32) + bl_ref[...]

    # variance = softplus(logvar) + softplus(_noise); component scale = sqrt(variance)
    variance = jax.nn.softplus(logvar) + noise_sp_ref[0]

    mean_ref[...] = mean
    scale_ref[...] = jnp.sqrt(variance)
    logits_ref[...] = logits


@functools.partial(jax.jit,
                   static_argnames=("output_dim", "mixture_size", "block_b"))
def mdn_forward(x, params, noise, *, output_dim, mixture_size, block_b=128):
    """Returns (mean, scale, weight_logits), each (B, output_dim, mixture_size)."""
    B, input_dim = x.shape
    om = output_dim * mixture_size
    om_pad = _round_up(om, 128)          # lane-dense output width

    # --- split final layer into 3 heads, zero-pad each to om_pad columns ----
    wf, bf = params[-1]                  # (H, 3*om), (1, 3*om)
    head_ws, head_bs = [], []
    for k in range(3):
        wk = wf[:, k * om:(k + 1) * om]
        bk = bf[:, k * om:(k + 1) * om]
        head_ws.append(jnp.pad(wk, ((0, 0), (0, om_pad - om))))
        head_bs.append(jnp.pad(bk, ((0, 0), (0, om_pad - om))))

    flat_params = []
    for (w, b) in params[:-1]:
        flat_params += [w, b]
    for wk, bk in zip(head_ws, head_bs):
        flat_params += [wk, bk]

    # --- batch tiling (pad B up to a multiple of the tile) ------------------
    TB = min(block_b, _round_up(B, 8))
    B_pad = _round_up(B, TB)
    if B_pad != B:
        x = jnp.pad(x, ((0, B_pad - B), (0, 0)))
    grid = (B_pad // TB,)

    # Batch-independent scalar computed once, outside the kernel.
    noise_sp = jax.nn.softplus(noise).astype(jnp.float32)     # (1,)

    # --- specs ---------------------------------------------------------------
    x_spec = pl.BlockSpec((TB, input_dim), lambda i: (i, 0))
    out_spec = pl.BlockSpec((TB, om_pad), lambda i: (i, 0))
    # Weights/biases: full-array blocks, constant index_map -> VMEM-resident.
    param_specs = [pl.BlockSpec(p.shape, lambda i: (0, 0)) for p in flat_params]
    smem_spec = pl.BlockSpec(memory_space=pltpu.MemorySpace.SMEM)

    # --- cost estimate -------------------------------------------------------
    dims = [input_dim] + [w.shape[1] for (w, _) in params[:-1]]
    mm_flops_per_row = sum(2 * a * c for a, c in zip(dims[:-1], dims[1:]))
    mm_flops_per_row += 3 * 2 * dims[-1] * om_pad
    flops = int(B_pad * mm_flops_per_row)
    transcendentals = int(B_pad * (sum(dims[1:]) + om_pad))    # sigmoids + softplus
    bytes_weights = int(sum(int(np.prod(p.shape)) for p in flat_params) * 4)
    bytes_accessed = int(4 * B_pad * (input_dim + 3 * om_pad) + bytes_weights)
    cost = pl.CostEstimate(flops=flops, transcendentals=transcendentals,
                           bytes_accessed=bytes_accessed)

    out_shapes = tuple(jax.ShapeDtypeStruct((B_pad, om_pad), jnp.float32)
                       for _ in range(3))

    mean, scale, logits = pl.pallas_call(
        _mdn_kernel,
        out_shape=out_shapes,
        grid=grid,
        in_specs=[smem_spec, x_spec] + param_specs,
        out_specs=(out_spec, out_spec, out_spec),
        compiler_params=pltpu.CompilerParams(
            dimension_semantics=("parallel",),        # shard batch across TCs (v7x)
            vmem_limit_bytes=32 * 1024 * 1024,        # explicit; safe on v5e/v6e/v7x
        ),
        cost_estimate=cost,
    )(noise_sp, x, *flat_params)

    # Strip batch/lane padding and reshape in plain XLA (free plumbing).
    mean = mean[:B, :om].reshape(B, output_dim, mixture_size)
    scale = scale[:B, :om].reshape(B, output_dim, mixture_size)
    logits = logits[:B, :om].reshape(B, output_dim, mixture_size)
    return mean, scale, logits


def init_params(key, input_dim, hidden_dims, output_dim, mixture_size):
    """Deterministic Linear-layer init (PyTorch-style uniform ±1/sqrt(fan_in))."""
    dims = [input_dim] + list(hidden_dims) + [3 * mixture_size * output_dim]
    params = []
    for i in range(len(dims) - 1):
        fan_in, fan_out = dims[i], dims[i + 1]
        key, kw, kb = jax.random.split(key, 3)
        bound = 1.0 / np.sqrt(fan_in)
        w = jax.random.uniform(kw, (fan_in, fan_out), jnp.float32, -bound, bound)
        b = jax.random.uniform(kb, (1, fan_out), jnp.float32, -bound, bound)
        params.append((w, b))
    return params


def mdn_reference(x, params, noise, output_dim, mixture_size):
    """Pure-JAX reference mirroring the PyTorch forward."""
    h = x
    for (w, b) in params[:-1]:
        z = h @ w + b
        h = z * jax.nn.sigmoid(z)
    wf, bf = params[-1]
    out = h @ wf + bf
    out = out.reshape(x.shape[0], 3, output_dim, mixture_size)
    mean, logvar, weight_logits = out[:, 0], out[:, 1], out[:, 2]
    variance = jax.nn.softplus(logvar) + jax.nn.softplus(noise[0])
    return mean, jnp.sqrt(variance), weight_logits


if __name__ == "__main__":
    # Small, MDN-consistent shapes (hidden width 128 -> lane-full weight tiles;
    # B=256 with TB=128 exercises the batch grid / double-buffering path).
    B = 256
    input_dim = 8
    output_dim = 4
    mixture_size = 10
    hidden_dims = (128, 128, 128, 128)

    key = jax.random.PRNGKey(0)
    key, kx = jax.random.split(key)
    x = jax.random.normal(kx, (B, input_dim), jnp.float32)

    params = init_params(key, input_dim, hidden_dims, output_dim, mixture_size)
    noise = jnp.zeros((1,), jnp.float32)  # the module's `_noise` parameter

    mean, scale, logits = mdn_forward(
        x, params, noise, output_dim=output_dim, mixture_size=mixture_size)
    jax.block_until_ready((mean, scale, logits))

    ref_mean, ref_scale, ref_logits = mdn_reference(
        x, params, noise, output_dim, mixture_size)

    np.testing.assert_allclose(np.asarray(mean), np.asarray(ref_mean),
                               rtol=1e-4, atol=1e-4)
    np.testing.assert_allclose(np.asarray(scale), np.asarray(ref_scale),
                               rtol=1e-4, atol=1e-4)
    np.testing.assert_allclose(np.asarray(logits), np.asarray(ref_logits),
                               rtol=1e-4, atol=1e-4)

    print("KERNEL_OK")
</pallas_src>

<mosaic_0001>
module attributes {stable_mosaic.version = 11 : i64} {
  func.func @_mdn_kernel(%arg0: i32, %arg1: memref<1xf32, #tpu.memory_space<smem>>, %arg2: memref<128x8xf32, #tpu.memory_space<vmem>>, %arg3: memref<8x128xf32, #tpu.memory_space<vmem>>, %arg4: memref<1x128xf32, #tpu.memory_space<vmem>>, %arg5: memref<128x128xf32, #tpu.memory_space<vmem>>, %arg6: memref<1x128xf32, #tpu.memory_space<vmem>>, %arg7: memref<128x128xf32, #tpu.memory_space<vmem>>, %arg8: memref<1x128xf32, #tpu.memory_space<vmem>>, %arg9: memref<128x128xf32, #tpu.memory_space<vmem>>, %arg10: memref<1x128xf32, #tpu.memory_space<vmem>>, %arg11: memref<128x128xf32, #tpu.memory_space<vmem>>, %arg12: memref<1x128xf32, #tpu.memory_space<vmem>>, %arg13: memref<128x128xf32, #tpu.memory_space<vmem>>, %arg14: memref<1x128xf32, #tpu.memory_space<vmem>>, %arg15: memref<128x128xf32, #tpu.memory_space<vmem>>, %arg16: memref<1x128xf32, #tpu.memory_space<vmem>>, %arg17: memref<128x128xf32, #tpu.memory_space<vmem>>, %arg18: memref<128x128xf32, #tpu.memory_space<vmem>>, %arg19: memref<128x128xf32, #tpu.memory_space<vmem>>) attributes {dimension_semantics = [#tpu.dimension_semantics<parallel>], iteration_bounds = array<i64: 2>, scalar_prefetch = 0 : i64, scratch_operands = 0 : i64, tpu.core_type = #tpu.core_type<tc>, window_params = [{transform_indices = @transform_0, window_bounds = array<i64: 1>}, {transform_indices = @transform_1, window_bounds = array<i64: 128, 8>}, {pipeline_mode = #tpu.pipeline_mode<synchronous>, transform_indices = @transform_2, window_bounds = array<i64: 8, 128>}, {pipeline_mode = #tpu.pipeline_mode<synchronous>, transform_indices = @transform_3, window_bounds = array<i64: 1, 128>}, {pipeline_mode = #tpu.pipeline_mode<synchronous>, transform_indices = @transform_4, window_bounds = array<i64: 128, 128>}, {pipeline_mode = #tpu.pipeline_mode<synchronous>, transform_indices = @transform_5, window_bounds = array<i64: 1, 128>}, {pipeline_mode = #tpu.pipeline_mode<synchronous>, transform_indices = @transform_6, window_bounds = array<i64: 128, 128>}, {pipeline_mode = #tpu.pipeline_mode<synchronous>, transform_indices = @transform_7, window_bounds = array<i64: 1, 128>}, {pipeline_mode = #tpu.pipeline_mode<synchronous>, transform_indices = @transform_8, window_bounds = array<i64: 128, 128>}, {pipeline_mode = #tpu.pipeline_mode<synchronous>, transform_indices = @transform_9, window_bounds = array<i64: 1, 128>}, {pipeline_mode = #tpu.pipeline_mode<synchronous>, transform_indices = @transform_10, window_bounds = array<i64: 128, 128>}, {pipeline_mode = #tpu.pipeline_mode<synchronous>, transform_indices = @transform_11, window_bounds = array<i64: 1, 128>}, {pipeline_mode = #tpu.pipeline_mode<synchronous>, transform_indices = @transform_12, window_bounds = array<i64: 128, 128>}, {pipeline_mode = #tpu.pipeline_mode<synchronous>, transform_indices = @transform_13, window_bounds = array<i64: 1, 128>}, {pipeline_mode = #tpu.pipeline_mode<synchronous>, transform_indices = @transform_14, window_bounds = array<i64: 128, 128>}, {pipeline_mode = #tpu.pipeline_mode<synchronous>, transform_indices = @transform_15, window_bounds = array<i64: 1, 128>}, {transform_indices = @transform_16, window_bounds = array<i64: 128, 128>}, {transform_indices = @transform_17, window_bounds = array<i64: 128, 128>}, {transform_indices = @transform_18, window_bounds = array<i64: 128, 128>}]} {
    %c0 = arith.constant 0 : index
    %c0_0 = arith.constant 0 : index
    %0 = vector.load %arg2[%c0, %c0_0] : memref<128x8xf32, #tpu.memory_space<vmem>>, vector<128x8xf32>
    %c0_1 = arith.constant 0 : index
    %c0_2 = arith.constant 0 : index
    %1 = vector.load %arg3[%c0_1, %c0_2] : memref<8x128xf32, #tpu.memory_space<vmem>>, vector<8x128xf32>
    %cst = arith.constant dense<0.000000e+00> : vector<128x128xf32>
    %2 = tpu.matmul %0, %1, %cst {dimension_numbers = #tpu.dot_dimension_numbers<[1], [0], [0], [1], [0, 0, 1, 1], [], []>} : vector<128x8xf32>, vector<8x128xf32>, vector<128x128xf32> -> vector<128x128xf32>
    %c0_3 = arith.constant 0 : index
    %c0_4 = arith.constant 0 : index
    %3 = vector.load %arg4[%c0_3, %c0_4] : memref<1x128xf32, #tpu.memory_space<vmem>>, vector<1x128xf32>
    %4 = vector.broadcast %3 : vector<1x128xf32> to vector<128x128xf32>
    %5 = arith.addf %2, %4 : vector<128x128xf32>
    %6 = arith.negf %5 : vector<128x128xf32>
    %7 = math.exp %6 : vector<128x128xf32>
    %cst_5 = arith.constant 1.000000e+00 : f32
    %8 = vector.broadcast %cst_5 : f32 to vector<128x128xf32>
    %9 = arith.addf %8, %7 : vector<128x128xf32>
    %10 = arith.divf %8, %9 : vector<128x128xf32>
    %11 = arith.mulf %5, %10 : vector<128x128xf32>
    %c0_6 = arith.constant 0 : index
    %c0_7 = arith.constant 0 : index
    %12 = vector.load %arg5[%c0_6, %c0_7] : memref<128x128xf32, #tpu.memory_space<vmem>>, vector<128x128xf32>
    %cst_8 = arith.constant dense<0.000000e+00> : vector<128x128xf32>
    %13 = tpu.matmul %11, %12, %cst_8 {dimension_numbers = #tpu.dot_dimension_numbers<[1], [0], [0], [1], [0, 0, 1, 1], [], []>} : vector<128x128xf32>, vector<128x128xf32>, vector<128x128xf32> -> vector<128x128xf32>
    %c0_9 = arith.constant 0 : index
    %c0_10 = arith.constant 0 : index
    %14 = vector.load %arg6[%c0_9, %c0_10] : memref<1x128xf32, #tpu.memory_space<vmem>>, vector<1x128xf32>
    %15 = vector.broadcast %14 : vector<1x128xf32> to vector<128x128xf32>
    %16 = arith.addf %13, %15 : vector<128x128xf32>
    %17 = arith.negf %16 : vector<128x128xf32>
    %18 = math.exp %17 : vector<128x128xf32>
    %cst_11 = arith.constant 1.000000e+00 : f32
    %19 = vector.broadcast %cst_11 : f32 to vector<128x128xf32>
    %20 = arith.addf %19, %18 : vector<128x128xf32>
    %21 = arith.divf %19, %20 : vector<128x128xf32>
    %22 = arith.mulf %16, %21 : vector<128x128xf32>
    %c0_12 = arith.constant 0 : index
    %c0_13 = arith.constant 0 : index
    %23 = vector.load %arg7[%c0_12, %c0_13] : memref<128x128xf32, #tpu.memory_space<vmem>>, vector<128x128xf32>
    %cst_14 = arith.constant dense<0.000000e+00> : vector<128x128xf32>
    %24 = tpu.matmul %22, %23, %cst_14 {dimension_numbers = #tpu.dot_dimension_numbers<[1], [0], [0], [1], [0, 0, 1, 1], [], []>} : vector<128x128xf32>, vector<128x128xf32>, vector<128x128xf32> -> vector<128x128xf32>
    %c0_15 = arith.constant 0 : index
    %c0_16 = arith.constant 0 : index
    %25 = vector.load %arg8[%c0_15, %c0_16] : memref<1x128xf32, #tpu.memory_space<vmem>>, vector<1x128xf32>
    %26 = vector.broadcast %25 : vector<1x128xf32> to vector<128x128xf32>
    %27 = arith.addf %24, %26 : vector<128x128xf32>
    %28 = arith.negf %27 : vector<128x128xf32>
    %29 = math.exp %28 : vector<128x128xf32>
    %cst_17 = arith.constant 1.000000e+00 : f32
    %30 = vector.broadcast %cst_17 : f32 to vector<128x128xf32>
    %31 = arith.addf %30, %29 : vector<128x128xf32>
    %32 = arith.divf %30, %31 : vector<128x128xf32>
    %33 = arith.mulf %27, %32 : vector<128x128xf32>
    %c0_18 = arith.constant 0 : index
    %c0_19 = arith.constant 0 : index
    %34 = vector.load %arg9[%c0_18, %c0_19] : memref<128x128xf32, #tpu.memory_space<vmem>>, vector<128x128xf32>
    %cst_20 = arith.constant dense<0.000000e+00> : vector<128x128xf32>
    %35 = tpu.matmul %33, %34, %cst_20 {dimension_numbers = #tpu.dot_dimension_numbers<[1], [0], [0], [1], [0, 0, 1, 1], [], []>} : vector<128x128xf32>, vector<128x128xf32>, vector<128x128xf32> -> vector<128x128xf32>
    %c0_21 = arith.constant 0 : index
    %c0_22 = arith.constant 0 : index
    %36 = vector.load %arg10[%c0_21, %c0_22] : memref<1x128xf32, #tpu.memory_space<vmem>>, vector<1x128xf32>
    %37 = vector.broadcast %36 : vector<1x128xf32> to vector<128x128xf32>
    %38 = arith.addf %35, %37 : vector<128x128xf32>
    %39 = arith.negf %38 : vector<128x128xf32>
    %40 = math.exp %39 : vector<128x128xf32>
    %cst_23 = arith.constant 1.000000e+00 : f32
    %41 = vector.broadcast %cst_23 : f32 to vector<128x128xf32>
    %42 = arith.addf %41, %40 : vector<128x128xf32>
    %43 = arith.divf %41, %42 : vector<128x128xf32>
    %44 = arith.mulf %38, %43 : vector<128x128xf32>
    %c0_24 = arith.constant 0 : index
    %c0_25 = arith.constant 0 : index
    %45 = vector.load %arg11[%c0_24, %c0_25] : memref<128x128xf32, #tpu.memory_space<vmem>>, vector<128x128xf32>
    %cst_26 = arith.constant dense<0.000000e+00> : vector<128x128xf32>
    %46 = tpu.matmul %44, %45, %cst_26 {dimension_numbers = #tpu.dot_dimension_numbers<[1], [0], [0], [1], [0, 0, 1, 1], [], []>} : vector<128x128xf32>, vector<128x128xf32>, vector<128x128xf32> -> vector<128x128xf32>
    %c0_27 = arith.constant 0 : index
    %c0_28 = arith.constant 0 : index
    %47 = vector.load %arg12[%c0_27, %c0_28] : memref<1x128xf32, #tpu.memory_space<vmem>>, vector<1x128xf32>
    %48 = vector.broadcast %47 : vector<1x128xf32> to vector<128x128xf32>
    %49 = arith.addf %46, %48 : vector<128x128xf32>
    %c0_29 = arith.constant 0 : index
    %c0_30 = arith.constant 0 : index
    %50 = vector.load %arg13[%c0_29, %c0_30] : memref<128x128xf32, #tpu.memory_space<vmem>>, vector<128x128xf32>
    %cst_31 = arith.constant dense<0.000000e+00> : vector<128x128xf32>
    %51 = tpu.matmul %44, %50, %cst_31 {dimension_numbers = #tpu.dot_dimension_numbers<[1], [0], [0], [1], [0, 0, 1, 1], [], []>} : vector<128x128xf32>, vector<128x128xf32>, vector<128x128xf32> -> vector<128x128xf32>
    %c0_32 = arith.constant 0 : index
    %c0_33 = arith.constant 0 : index
    %52 = vector.load %arg14[%c0_32, %c0_33] : memref<1x128xf32, #tpu.memory_space<vmem>>, vector<1x128xf32>
    %53 = vector.broadcast %52 : vector<1x128xf32> to vector<128x128xf32>
    %54 = arith.addf %51, %53 : vector<128x128xf32>
    %c0_34 = arith.constant 0 : index
    %c0_35 = arith.constant 0 : index
    %55 = vector.load %arg15[%c0_34, %c0_35] : memref<128x128xf32, #tpu.memory_space<vmem>>, vector<128x128xf32>
    %cst_36 = arith.constant dense<0.000000e+00> : vector<128x128xf32>
    %56 = tpu.matmul %44, %55, %cst_36 {dimension_numbers = #tpu.dot_dimension_numbers<[1], [0], [0], [1], [0, 0, 1, 1], [], []>} : vector<128x128xf32>, vector<128x128xf32>, vector<128x128xf32> -> vector<128x128xf32>
    %c0_37 = arith.constant 0 : index
    %c0_38 = arith.constant 0 : index
    %57 = vector.load %arg16[%c0_37, %c0_38] : memref<1x128xf32, #tpu.memory_space<vmem>>, vector<1x128xf32>
    %58 = vector.broadcast %57 : vector<1x128xf32> to vector<128x128xf32>
    %59 = arith.addf %56, %58 : vector<128x128xf32>
    %cst_39 = arith.constant 0.000000e+00 : f32
    %60 = vector.broadcast %cst_39 : f32 to vector<128x128xf32>
    %61 = arith.maximumf %54, %60 : vector<128x128xf32>
    %62 = vector.broadcast %cst_39 : f32 to vector<128x128xf32>
    %63 = arith.subf %54, %62 : vector<128x128xf32>
    %64 = arith.cmpf one, %63, %63 : vector<128x128xf32>
    %65 = vector.broadcast %cst_39 : f32 to vector<128x128xf32>
    %66 = arith.addf %54, %65 : vector<128x128xf32>
    %67 = math.absf %63 : vector<128x128xf32>
    %cst_40 = arith.constant 0.000000e+00 : f32
    %68 = vector.broadcast %cst_40 : f32 to vector<128x128xf32>
    %69 = arith.subf %68, %67 : vector<128x128xf32>
    %70 = math.exp %69 : vector<128x128xf32>
    %71 = math.log1p %70 : vector<128x128xf32>
    %72 = arith.addf %61, %71 : vector<128x128xf32>
    %73 = arith.select %64, %66, %72 : vector<128x128xi1>, vector<128x128xf32>
    %c0_41 = arith.constant 0 : index
    %74 = memref.load %arg1[%c0_41] : memref<1xf32, #tpu.memory_space<smem>>
    %75 = vector.broadcast %74 : f32 to vector<128x128xf32>
    %76 = arith.addf %73, %75 : vector<128x128xf32>
    %c0_42 = arith.constant 0 : index
    %c0_43 = arith.constant 0 : index
    %77 = vector.load %arg17[%c0_42, %c0_43] : memref<128x128xf32, #tpu.memory_space<vmem>>, vector<128x128xf32>
    tpu.vector_store %arg17[%c0_42, %c0_43], %49 {strides = array<i32>} : memref<128x128xf32, #tpu.memory_space<vmem>>, vector<128x128xf32>,
    %78 = math.sqrt %76 : vector<128x128xf32>
    %c0_44 = arith.constant 0 : index
    %c0_45 = arith.constant 0 : index
    %79 = vector.load %arg18[%c0_44, %c0_45] : memref<128x128xf32, #tpu.memory_space<vmem>>, vector<128x128xf32>
    tpu.vector_store %arg18[%c0_44, %c0_45], %78 {strides = array<i32>} : memref<128x128xf32, #tpu.memory_space<vmem>>, vector<128x128xf32>,
    %c0_46 = arith.constant 0 : index
    %c0_47 = arith.constant 0 : index
    %80 = vector.load %arg19[%c0_46, %c0_47] : memref<128x128xf32, #tpu.memory_space<vmem>>, vector<128x128xf32>
    tpu.vector_store %arg19[%c0_46, %c0_47], %59 {strides = array<i32>} : memref<128x128xf32, #tpu.memory_space<vmem>>, vector<128x128xf32>,
    return
  }
  func.func @transform_0(%arg0: i32) -> i32 {
    %c0_i32 = arith.constant 0 : i32
    %c0_i32_0 = arith.constant 0 : i32
    return %c0_i32 : i32
  }
  func.func @transform_1(%arg0: i32) -> (i32, i32) {
    %c0_i32 = arith.constant 0 : i32
    %c0_i32_0 = arith.constant 0 : i32
    return %arg0, %c0_i32 : i32, i32
  }
  func.func @transform_2(%arg0: i32) -> (i32, i32) {
    %c0_i32 = arith.constant 0 : i32
    %c0_i32_0 = arith.constant 0 : i32
    %c0_i32_1 = arith.constant 0 : i32
    return %c0_i32, %c0_i32_0 : i32, i32
  }
  func.func @transform_3(%arg0: i32) -> (i32, i32) {
    %c0_i32 = arith.constant 0 : i32
    %c0_i32_0 = arith.constant 0 : i32
    %c0_i32_1 = arith.constant 0 : i32
    return %c0_i32, %c0_i32_0 : i32, i32
  }
  func.func @transform_4(%arg0: i32) -> (i32, i32) {
    %c0_i32 = arith.constant 0 : i32
    %c0_i32_0 = arith.constant 0 : i32
    %c0_i32_1 = arith.constant 0 : i32
    return %c0_i32, %c0_i32_0 : i32, i32
  }
  func.func @transform_5(%arg0: i32) -> (i32, i32) {
    %c0_i32 = arith.constant 0 : i32
    %c0_i32_0 = arith.constant 0 : i32
    %c0_i32_1 = arith.constant 0 : i32
    return %c0_i32, %c0_i32_0 : i32, i32
  }
  func.func @transform_6(%arg0: i32) -> (i32, i32) {
    %c0_i32 = arith.constant 0 : i32
    %c0_i32_0 = arith.constant 0 : i32
    %c0_i32_1 = arith.constant 0 : i32
    return %c0_i32, %c0_i32_0 : i32, i32
  }
  func.func @transform_7(%arg0: i32) -> (i32, i32) {
    %c0_i32 = arith.constant 0 : i32
    %c0_i32_0 = arith.constant 0 : i32
    %c0_i32_1 = arith.constant 0 : i32
    return %c0_i32, %c0_i32_0 : i32, i32
  }
  func.func @transform_8(%arg0: i32) -> (i32, i32) {
    %c0_i32 = arith.constant 0 : i32
    %c0_i32_0 = arith.constant 0 : i32
    %c0_i32_1 = arith.constant 0 : i32
    return %c0_i32, %c0_i32_0 : i32, i32
  }
  func.func @transform_9(%arg0: i32) -> (i32, i32) {
    %c0_i32 = arith.constant 0 : i32
    %c0_i32_0 = arith.constant 0 : i32
    %c0_i32_1 = arith.constant 0 : i32
    return %c0_i32, %c0_i32_0 : i32, i32
  }
  func.func @transform_10(%arg0: i32) -> (i32, i32) {
    %c0_i32 = arith.constant 0 : i32
    %c0_i32_0 = arith.constant 0 : i32
    %c0_i32_1 = arith.constant 0 : i32
    return %c0_i32, %c0_i32_0 : i32, i32
  }
  func.func @transform_11(%arg0: i32) -> (i32, i32) {
    %c0_i32 = arith.constant 0 : i32
    %c0_i32_0 = arith.constant 0 : i32
    %c0_i32_1 = arith.constant 0 : i32
    return %c0_i32, %c0_i32_0 : i32, i32
  }
  func.func @transform_12(%arg0: i32) -> (i32, i32) {
    %c0_i32 = arith.constant 0 : i32
    %c0_i32_0 = arith.constant 0 : i32
    %c0_i32_1 = arith.constant 0 : i32
    return %c0_i32, %c0_i32_0 : i32, i32
  }
  func.func @transform_13(%arg0: i32) -> (i32, i32) {
    %c0_i32 = arith.constant 0 : i32
    %c0_i32_0 = arith.constant 0 : i32
    %c0_i32_1 = arith.constant 0 : i32
    return %c0_i32, %c0_i32_0 : i32, i32
  }
  func.func @transform_14(%arg0: i32) -> (i32, i32) {
    %c0_i32 = arith.constant 0 : i32
    %c0_i32_0 = arith.constant 0 : i32
    %c0_i32_1 = arith.constant 0 : i32
    return %c0_i32, %c0_i32_0 : i32, i32
  }
  func.func @transform_15(%arg0: i32) -> (i32, i32) {
    %c0_i32 = arith.constant 0 : i32
    %c0_i32_0 = arith.constant 0 : i32
    %c0_i32_1 = arith.constant 0 : i32
    return %c0_i32, %c0_i32_0 : i32, i32
  }
  func.func @transform_16(%arg0: i32) -> (i32, i32) {
    %c0_i32 = arith.constant 0 : i32
    %c0_i32_0 = arith.constant 0 : i32
    return %arg0, %c0_i32 : i32, i32
  }
  func.func @transform_17(%arg0: i32) -> (i32, i32) {
    %c0_i32 = arith.constant 0 : i32
    %c0_i32_0 = arith.constant 0 : i32
    return %arg0, %c0_i32 : i32, i32
  }
  func.func @transform_18(%arg0: i32) -> (i32, i32) {
    %c0_i32 = arith.constant 0 : i32
    %c0_i32_0 = arith.constant 0 : i32
    return %arg0, %c0_i32 : i32, i32
  }
}

</mosaic_0001>

<bundles_post_ra>
// kernel: mdn_forward.1
= control target key start
LH: loop header
LB: loop body
LE: loop exit
PB: predicated region body
PF: predicated region fallthrough
CT: control target
= control target key end

     0   :  { %s4202_s30 = smov 0   ;;  %s5616_s0 = inlined_call_operand.<no memory space> [shape: f32[1], index: 0, kind: input, shape index: {}]   ;;  %s5617_s1 = inlined_call_operand.vmem [shape: f32[256,8], index: 1, kind: input, shape index: {}]   ;;  %s5618_s2 = inlined_call_operand.vmem [shape: f32[8,128], index: 2, kind: input, shape index: {}]   ;;  %s5619_s3 = inlined_call_operand.vmem [shape: f32[1,128], index: 3, kind: input, shape index: {}]   ;;  %s5620_s4 = inlined_call_operand.vmem [shape: f32[128,128], index: 4, kind: input, shape index: {}]   ;;  %s5621_s5 = inlined_call_operand.vmem [shape: f32[1,128], index: 5, kind: input, shape index: {}]   ;;  %s5622_s6 = inlined_call_operand.vmem [shape: f32[128,128], index: 6, kind: input, shape index: {}]   ;;  %s5623_s7 = inlined_call_operand.vmem [shape: f32[1,128], index: 7, kind: input, shape index: {}]   ;;  %s5624_s8 = inlined_call_operand.vmem [shape: f32[128,128], index: 8, kind: input, shape index: {}]   ;;  %s5625_s9 = inlined_call_operand.vmem [shape: f32[1,128], index: 9, kind: input, shape index: {}]   ;;  %s5626_s10 = inlined_call_operand.vmem [shape: f32[128,128], index: 10, kind: input, shape index: {}]   ;;  %s5627_s11 = inlined_call_operand.vmem [shape: f32[1,128], index: 11, kind: input, shape index: {}]   ;;  %s5628_s12 = inlined_call_operand.vmem [shape: f32[128,128], index: 12, kind: input, shape index: {}]   ;;  %s5629_s13 = inlined_call_operand.vmem [shape: f32[1,128], index: 13, kind: input, shape index: {}]   ;;  %s5630_s14 = inlined_call_operand.vmem [shape: f32[128,128], index: 14, kind: input, shape index: {}]   ;;  %s5631_s15 = inlined_call_operand.vmem [shape: f32[1,128], index: 15, kind: input, shape index: {}]   ;;  %s5632_s16 = inlined_call_operand.vmem [shape: f32[256,128], index: 16, kind: output, shape index: {0}]   ;;  %s5633_s17 = inlined_call_operand.vmem [shape: f32[256,128], index: 17, kind: output, shape index: {1}]   ;;  %s5634_s18 = inlined_call_operand.vmem [shape: f32[256,128], index: 18, kind: output, shape index: {2}]  }
   0x1   :  { %5635 = sst [smem:[#allocation3_spill]] %s5616_s0 }
   0x2   :  { %5636 = sst [smem:[#allocation4_spill]] %s5617_s1  ;;  %s5638_s29 = sld [smem:[#allocation3_spill]] }
   0x3   :  { %5637 = sst [smem:[#allocation5_spill]] %s5618_s2 }
   0x8   :  { %24 = sst [smem:[#allocation2]] %s5638_s29 }
   0x9 LB: > { %s2871_s0 = sadd.s32 4294967295, %s4102_s30   ;;  %p2875_p0 = scmp.ge.s32.totalorder %s4102_s30, 1  ;;  %s4102_s30 = sphi %s4202_s30, %s30_s30  }
   0xa   : > { %p519_p1 = scmp.lt.s32.totalorder %s4102_s30, 3 }
   0xc   : > { %p520_p2 = pnand %p2875_p0, %p519_p1 }
   0xd   : > { %s5639_s20 = sld [smem:[#allocation5_spill]] (!%p520_p2)  ;;  %s2876_s21 = sshll.u32 (!%p520_p2), %s2871_s0, 4  ;;  %vm631_vm0 = vcmask (!%p520_p2), 64512   ;;  %v937_v17 = vld [vmem:[%s5620_s4] sm:$0xff] (!%p520_p2)  ;;  %v938_v18 = vld [vmem:[%s5620_s4 + $0x8] sm:$0xff] (!%p520_p2)  ;;  %v939_v20 = vld [vmem:[%s5620_s4 + $0x10] sm:$0xff] (!%p520_p2) }
   0xe   : > { %523 = sbr.rel (%p520_p2) target bundleno = 1348 (0x544), region = 84  ;;  %p584_p3 = scmp.lt.s32.totalorder (!%p520_p2), %s2876_s21, 31  ;;  %v3544_v19 = vpack.c.bf16 (!%p520_p2), %v938_v18, %v937_v17  ;;  %v940_v21 = vld [vmem:[%s5620_s4 + $0x18] sm:$0xff] (!%p520_p2)  ;;  %v941_v23 = vld [vmem:[%s5620_s4 + $0x20] sm:$0xff] (!%p520_p2)  ;;  %v942_v24 = vld [vmem:[%s5620_s4 + $0x28] sm:$0xff] (!%p520_p2) }
   0xf   : > { %s5640_s24 = sld [smem:[#allocation4_spill]] (!%p520_p2)  ;;  %v3548_v22 = vpack.c.bf16 (!%p520_p2), %v940_v21, %v939_v20  ;;  %v3552_v25 = vpack.c.bf16 (!%p520_p2), %v942_v24, %v941_v23  ;;  %v943_v26 = vld [vmem:[%s5620_s4 + $0x30] sm:$0xff] (!%p520_p2)  ;;  %v944_v27 = vld [vmem:[%s5620_s4 + $0x38] sm:$0xff] (!%p520_p2)  ;;  %v945_v29 = vld [vmem:[%s5620_s4 + $0x40] sm:$0xff] (!%p520_p2) }
  0x10   : > { %3545 = vmatprep.subr.bf16.mxu1 (!%p520_p2), %v3544_v19  ;;  %v3556_v28 = vpack.c.bf16 (!%p520_p2), %v944_v27, %v943_v26  ;;  %v946_v30 = vld [vmem:[%s5620_s4 + $0x48] sm:$0xff] (!%p520_p2)  ;;  %v947_v32 = vld [vmem:[%s5620_s4 + $0x50] sm:$0xff] (!%p520_p2)  ;;  %v948_v33 = vld [vmem:[%s5620_s4 + $0x58] sm:$0xff] (!%p520_p2) }
  0x11   : > { %3547 = vmatpush3.bf16.msra.mxu1 (!%p520_p2), %v3544_v19  ;;  %v3560_v31 = vpack.c.bf16 (!%p520_p2), %v946_v30, %v945_v29  ;;  %v3564_v34 = vpack.c.bf16 (!%p520_p2), %v948_v33, %v947_v32  ;;  %v949_v35 = vld [vmem:[%s5620_s4 + $0x60] sm:$0xff] (!%p520_p2)  ;;  %v950_v36 = vld [vmem:[%s5620_s4 + $0x68] sm:$0xff] (!%p520_p2)  ;;  %v951_v38 = vld [vmem:[%s5620_s4 + $0x70] sm:$0xff] (!%p520_p2) }
  0x12   : > { %3549 = vmatprep.subr.bf16.mxu1 (!%p520_p2), %v3548_v22  ;;  %v3568_v37 = vpack.c.bf16 (!%p520_p2), %v950_v36, %v949_v35  ;;  %v952_v39 = vld [vmem:[%s5620_s4 + $0x78] sm:$0xff] (!%p520_p2)  ;;  %v4304_v41 = vld [vmem:[%s5619_s3] ss:$0 sm:$0xff] (!%p520_p2) }
  0x13   : > { %v623_v0 = vld [vmem:[%s5639_s20] sm:$0xff] (!%p520_p2)  ;;  %v3572_v40 = vpack.c.bf16 (!%p520_p2), %v952_v39, %v951_v38 }
  0x14   : > { %3182 = vmatprep.subr.mxu0 (!%p520_p2), %v623_v0 }
  0x15   : > { %3183 = vmatpush3.msra.mxu0 %v623_v0  ;;  %s5660_s21 = smov (!%p584_p3, %s2876_s21), 31  ;;  %3551 = vmatpush3.bf16.msra.mxu1 %v3548_v22 }
  0x16   : > { %s4213_s22 = sshll.u32 %s5660_s21, 3  ;;  %3553 = vmatprep.subr.bf16.mxu1 %v3552_v25 }
  0x17   : > { %s4219_s25 = scalar_lea.vmem %s5640_s24, %s4213_s22  ;;  %s4939_s24 = scalar_lea.vmem %s5632_s16, %s4213_s22 }
  0x18   : > { %v607_v1 = vld [vmem:[%s4219_s25] sm:$0xff]  ;;  %v608_v2 = vld [vmem:[%s4219_s25 + $0x8] sm:$0xff]  ;;  %v609_v3 = vld [vmem:[%s4219_s25 + $0x10] sm:$0xff]  ;;  %s5231_s28 = scalar_lea.vmem %s5633_s17, %s4213_s22  ;;  %s5423_s20 = scalar_lea.vmem %s5634_s18, %s4213_s22 }
  0x19   : > { %3184 = vmatprep.mubr.msk.f32.mxu0 %vm631_vm0, %v607_v1  ;;  %v610_v4 = vld [vmem:[%s4219_s25 + $0x18] sm:$0xff]  ;;  %v611_v5 = vld [vmem:[%s4219_s25 + $0x20] sm:$0xff]  ;;  %v612_v6 = vld [vmem:[%s4219_s25 + $0x28] sm:$0xff]  ;;  %3555 = vmatpush3.bf16.msra.mxu1 %v3552_v25 }
  0x1a   : > { %3185 = vmatmul.mubr.msk.f32.vlgmr.msra.gmra.mrb[0].mxu0 %vm631_vm0, %v608_v2  ;;  %v613_v7 = vld [vmem:[%s4219_s25 + $0x30] sm:$0xff]  ;;  %v614_v8 = vld [vmem:[%s4219_s25 + $0x38] sm:$0xff]  ;;  %v615_v9 = vld [vmem:[%s4219_s25 + $0x40] sm:$0xff]  ;;  %3557 = vmatprep.subr.bf16.mxu1 %v3556_v28 }
  0x1b   : > { %3187 = vmatprep.mubr.msk.f32.mxu0 %vm631_vm0, %v609_v3  ;;  %v616_v10 = vld [vmem:[%s4219_s25 + $0x48] sm:$0xff]  ;;  %v617_v11 = vld [vmem:[%s4219_s25 + $0x50] sm:$0xff]  ;;  %v618_v12 = vld [vmem:[%s4219_s25 + $0x58] sm:$0xff] }
  0x1c   : > { %v619_v13 = vld [vmem:[%s4219_s25 + $0x60] sm:$0xff]  ;;  %v620_v14 = vld [vmem:[%s4219_s25 + $0x68] sm:$0xff]  ;;  %v621_v15 = vld [vmem:[%s4219_s25 + $0x70] sm:$0xff] }
  0x1d   : > { %v622_v16 = vld [vmem:[%s4219_s25 + $0x78] sm:$0xff]  ;;  %3559 = vmatpush3.bf16.msra.mxu1 %v3556_v28  ;;  %s4977_s25 = sld [smem:[#allocation2]] }
  0x1e   : > { %3188 = vmatmul.mubr.msk.f32.gmra.mrb[2].mxu0 %vm631_vm0, %v610_v4  ;;  %3561 = vmatprep.subr.bf16.mxu1 %v3560_v31 }
  0x1f   : > { %3190 = vmatprep.mubr.msk.f32.mxu0 %vm631_vm0, %v611_v5 }
  0x21   : > { %3563 = vmatpush3.bf16.msra.mxu1 %v3560_v31 }
  0x22   : > { %3191 = vmatmul.mubr.msk.f32.gmra.mrb[4].mxu0 %vm631_vm0, %v612_v6  ;;  %3565 = vmatprep.subr.bf16.mxu1 %v3564_v34 }
  0x23   : > { %3193 = vmatprep.mubr.msk.f32.mxu0 %vm631_vm0, %v613_v7 }
  0x25   : > { %3567 = vmatpush3.bf16.msra.mxu1 %v3564_v34 }
  0x26   : > { %3194 = vmatmul.mubr.msk.f32.gmra.mrb[6].mxu0 %vm631_vm0, %v614_v8  ;;  %3569 = vmatprep.subr.bf16.mxu1 %v3568_v37 }
  0x27   : > { %3196 = vmatprep.mubr.msk.f32.mxu0 %vm631_vm0, %v615_v9 }
  0x29   : > { %3571 = vmatpush3.bf16.msra.mxu1 %v3568_v37 }
  0x2a   : > { %3197 = vmatmul.mubr.msk.f32.gmra.mrb[8].mxu0 %vm631_vm0, %v616_v10  ;;  %3573 = vmatprep.subr.bf16.mxu1 %v3572_v40 }
  0x2b   : > { %3199 = vmatprep.mubr.msk.f32.mxu0 %vm631_vm0, %v617_v11 }
  0x2d   : > { %3575 = vmatpush3.bf16.msra.mxu1 %v3572_v40 }
  0x2e   : > { %3200 = vmatmul.mubr.msk.f32.gmra.mrb[10].mxu0 %vm631_vm0, %v618_v12 }
  0x2f   : > { %3202 = vmatprep.mubr.msk.f32.mxu0 %vm631_vm0, %v619_v13 }
  0x32   : > { %3203 = vmatmul.mubr.msk.f32.gmra.mrb[12].mxu0 %vm631_vm0, %v620_v14 }
  0x33   : > { %3205 = vmatprep.mubr.msk.f32.mxu0 %vm631_vm0, %v621_v15 }
  0x36   : > { %3206 = vmatmul.mubr.msk.f32.gmra.mrb[14].mxu0 %vm631_vm0, %v622_v16 }
  0xed   : > { %v3186_v42 = vpop.f32.mrb[0].mxu0 }
  0xee   : > { %v4307_v43 = vadd.f32 %v3186_v42, %v4304_v41  ;;  %v746_v44 = vpop.f32.mrb[1].mxu0 }
  0xef   : > { %v4310_v45 = vadd.f32 %v4304_v41, %v746_v44 }
  0xf0   : > { %v2902_v46 = vmul.f32 -1.442695, %v4307_v43 }
  0xf1   : > { %v2901_v47 = vmul.f32 -1.442695, %v4310_v45  ;;  %v3189_v48 = vpop.f32.mrb[2].mxu0 }
  0xf2   : > { %3744 = vpow2.f32 %v2902_v46  ;;  %v4315_v49 = vadd.f32 %v3189_v48, %v4304_v41  ;;  %v756_v50 = vpop.f32.mrb[3].mxu0 }
  0xf3   : > { %3746 = vpow2.f32 %v2901_v47  ;;  %v4318_v51 = vadd.f32 %v4304_v41, %v756_v50 }
  0xf4   : > { %v2904_v52 = vmul.f32 -1.442695, %v4315_v49 }
  0xf5   : > { %v2903_v53 = vmul.f32 -1.442695, %v4318_v51  ;;  %v3192_v54 = vpop.f32.mrb[4].mxu0 }
  0xf6   : > { %3748 = vpow2.f32 %v2904_v52  ;;  %v4323_v55 = vadd.f32 %v3192_v54, %v4304_v41  ;;  %v766_v56 = vpop.f32.mrb[5].mxu0 }
  0xf7   : > { %3750 = vpow2.f32 %v2903_v53  ;;  %v4326_v57 = vadd.f32 %v4304_v41, %v766_v56 }
  0xf8   : > { %v2906_v58 = vmul.f32 -1.442695, %v4323_v55 }
  0xf9   : > { %v2905_v59 = vmul.f32 -1.442695, %v4326_v57  ;;  %v3195_v60 = vpop.f32.mrb[6].mxu0 }
  0xfa   : > { %3752 = vpow2.f32 %v2906_v58  ;;  %v4331_v61 = vadd.f32 %v3195_v60, %v4304_v41  ;;  %v776_v62 = vpop.f32.mrb[7].mxu0 }
  0xfb   : > { %3754 = vpow2.f32 %v2905_v59  ;;  %v4334_v63 = vadd.f32 %v4304_v41, %v776_v62 }
  0xfc   : > { %v3745_v0 = vpop.eup %3744  ;;  %v2908_v1 = vmul.f32 -1.442695, %v4331_v61 }
  0xfd   : > { %v3747_v2 = vpop.eup %3746  ;;  %v874_v3 = vadd.f32 1.0, %v3745_v0  ;;  %v2907_v4 = vmul.f32 -1.442695, %v4334_v63  ;;  %v3198_v5 = vpop.f32.mrb[8].mxu0 }
  0xfe   : > { %v873_v6 = vadd.f32 1.0, %v3747_v2  ;;  %3756 = vpow2.f32 %v2908_v1  ;;  %v4339_v7 = vadd.f32 %v3198_v5, %v4304_v41  ;;  %v786_v8 = vpop.f32.mrb[9].mxu0 }
  0xff   : > { %3758 = vrcp.f32 %v874_v3  ;;  %v4342_v9 = vadd.f32 %v4304_v41, %v786_v8 }
 0x100   : > { %v3749_v10 = vpop.eup %3748  ;;  %3760 = vrcp.f32 %v873_v6  ;;  %v2910_v11 = vmul.f32 -1.442695, %v4339_v7 }
 0x101   : > { %v3751_v12 = vpop.eup %3750  ;;  %v876_v13 = vadd.f32 1.0, %v3749_v10  ;;  %3762 = vpow2.f32 %v2907_v4  ;;  %v2909_v14 = vmul.f32 -1.442695, %v4342_v9  ;;  %v3201_v15 = vpop.f32.mrb[10].mxu0 }
 0x102   : > { %v875_v16 = vadd.f32 1.0, %v3751_v12  ;;  %3764 = vpow2.f32 %v2910_v11  ;;  %v4347_v17 = vadd.f32 %v3201_v15, %v4304_v41  ;;  %v796_v18 = vpop.f32.mrb[11].mxu0 }
 0x103   : > { %3766 = vrcp.f32 %v876_v13  ;;  %v4350_v19 = vadd.f32 %v4304_v41, %v796_v18 }
 0x104   : > { %v3753_v20 = vpop.eup %3752  ;;  %3768 = vrcp.f32 %v875_v16  ;;  %v2912_v21 = vmul.f32 -1.442695, %v4347_v17 }
 0x105   : > { %v3755_v22 = vpop.eup %3754  ;;  %v878_v23 = vadd.f32 1.0, %v3753_v20  ;;  %3770 = vpow2.f32 %v2909_v14  ;;  %v2911_v24 = vmul.f32 -1.442695, %v4350_v19  ;;  %v3204_v25 = vpop.f32.mrb[12].mxu0 }
 0x106   : > { %v877_v26 = vadd.f32 1.0, %v3755_v22  ;;  %3772 = vpow2.f32 %v2912_v21  ;;  %v4355_v27 = vadd.f32 %v3204_v25, %v4304_v41  ;;  %v806_v28 = vpop.f32.mrb[13].mxu0 }
 0x107   : > { %3774 = vrcp.f32 %v878_v23  ;;  %v4358_v29 = vadd.f32 %v4304_v41, %v806_v28 }
 0x108   : > { %v3757_v30 = vpop.eup %3756  ;;  %3776 = vrcp.f32 %v877_v26  ;;  %v2914_v31 = vmul.f32 -1.442695, %v4355_v27 }
 0x109   : > { %v3759_v32 = vpop.eup %3758  ;;  %v880_v33 = vadd.f32 1.0, %v3757_v30  ;;  %3778 = vpow2.f32 %v2911_v24  ;;  %v2913_v34 = vmul.f32 -1.442695, %v4358_v29  ;;  %v3207_v35 = vpop.f32.mrb[14].mxu0  ;;  %v1220_v30 = vld [vmem:[%s5622_s6 + $0x18] sm:$0xff] }
 0x10a   : > { %v3761_v36 = vpop.eup %3760  ;;  %3780 = vpow2.f32 %v2914_v31  ;;  %v4363_v37 = vadd.f32 %v3207_v35, %v4304_v41  ;;  %v816_v38 = vpop.f32.mrb[15].mxu0  ;;  %v922_v46 = vmul.f32 %v3759_v32, %v4307_v43  ;;  %v1221_v32 = vld [vmem:[%s5622_s6 + $0x20] sm:$0xff]  ;;  %v1223_v35 = vld [vmem:[%s5622_s6 + $0x30] sm:$0xff] }
 0x10b   : > { %v3763_v39 = vpop.eup %3762  ;;  %v4366_v40 = vadd.f32 %v4304_v41, %v816_v38  ;;  %v921_v42 = vmul.f32 %v3761_v36, %v4310_v45  ;;  %3782 = vpow2.f32 %v2913_v34  ;;  %v1224_v36 = vld [vmem:[%s5622_s6 + $0x38] sm:$0xff]  ;;  %v1225_v38 = vld [vmem:[%s5622_s6 + $0x40] sm:$0xff] }
 0x10c   : > { %v3765_v44 = vpop.eup %3764  ;;  %v879_v47 = vadd.f32 1.0, %v3763_v39  ;;  %v2916_v48 = vmul.f32 -1.442695, %v4363_v37  ;;  %3784 = vrcp.f32 %v880_v33  ;;  %v1222_v33 = vld [vmem:[%s5622_s6 + $0x28] sm:$0xff] }
 0x10d   : > { %v3767_v50 = vpop.eup %3766  ;;  %v882_v52 = vadd.f32 1.0, %v3765_v44  ;;  %v2915_v53 = vmul.f32 -1.442695, %v4366_v40  ;;  %3240 = vmatprep.mubr.f32.mxu1 %v921_v42  ;;  %v3584_v34 = vpack.c.bf16 %v1222_v33, %v1221_v32  ;;  %v1226_v39 = vld [vmem:[%s5622_s6 + $0x48] sm:$0xff]  ;;  %v1227_v42 = vld [vmem:[%s5622_s6 + $0x50] sm:$0xff]  ;;  %v1228_v44 = vld [vmem:[%s5622_s6 + $0x58] sm:$0xff] }
 0x10e   : > { %v3769_v54 = vpop.eup %3768  ;;  %3786 = vrcp.f32 %v879_v47  ;;  %3241 = vmatmul.mubr.f32.vlgmr.msra.gmra.mrb[0].mxu1 %v922_v46  ;;  %v924_v43 = vmul.f32 %v3767_v50, %v4315_v49  ;;  %v3596_v46 = vpack.c.bf16 %v1228_v44, %v1227_v42  ;;  %v1229_v47 = vld [vmem:[%s5622_s6 + $0x60] sm:$0xff] }
 0x10f   : > { %v3771_v41 = vpop.eup %3770  ;;  %v923_v56 = vmul.f32 %v3769_v54, %v4318_v51  ;;  %3788 = vrcp.f32 %v882_v52  ;;  %v1231_v52 = vld [vmem:[%s5622_s6 + $0x70] sm:$0xff] }
 0x110   : > { %v3773_v45 = vpop.eup %3772  ;;  %v881_v58 = vadd.f32 1.0, %v3771_v41  ;;  %3790 = vpow2.f32 %v2916_v48  ;;  %v1230_v48 = vld [vmem:[%s5622_s6 + $0x68] sm:$0xff]  ;;  %v4437_v41 = vld [vmem:[%s5621_s5] ss:$0 sm:$0xff] }
 0x111   : > { %v3775_v59 = vpop.eup %3774  ;;  %v884_v60 = vadd.f32 1.0, %v3773_v45  ;;  %3792 = vpow2.f32 %v2915_v53  ;;  %3243 = vmatprep.mubr.f32.mxu1 %v923_v56  ;;  %v3600_v50 = vpack.c.bf16 %v1230_v48, %v1229_v47  ;;  %v1232_v53 = vld [vmem:[%s5622_s6 + $0x78] sm:$0xff] }
 0x112   : > { %v3777_v62 = vpop.eup %3776  ;;  %3794 = vrcp.f32 %v881_v58  ;;  %3244 = vmatmul.mubr.f32.gmra.mrb[2].mxu1 %v924_v43  ;;  %v926_v3 = vmul.f32 %v3775_v59, %v4323_v55  ;;  %v3604_v54 = vpack.c.bf16 %v1232_v53, %v1231_v52 }
 0x113   : > { %v3779_v0 = vpop.eup %3778  ;;  %v925_v1 = vmul.f32 %v3777_v62, %v4326_v57  ;;  %3796 = vrcp.f32 %v884_v60 }
 0x114   : > { %v3781_v2 = vpop.eup %3780  ;;  %v883_v51 = vadd.f32 1.0, %v3779_v0 }
 0x115   : > { %v886_v4 = vadd.f32 1.0, %v3781_v2  ;;  %3246 = vmatprep.mubr.f32.mxu1 %v925_v1  ;;  %v3783_v49 = vpop.eup %3782 }
 0x116   : > { %3798 = vrcp.f32 %v883_v51  ;;  %3247 = vmatmul.mubr.f32.gmra.mrb[4].mxu1 %v926_v3  ;;  %v3785_v5 = vpop.eup %3784  ;;  %v885_v6 = vadd.f32 1.0, %v3783_v49 }
 0x117   : > { %3800 = vrcp.f32 %v886_v4  ;;  %v928_v57 = vmul.f32 %v3785_v5, %v4331_v61 }
 0x118   : > { %v3787_v8 = vpop.eup %3786  ;;  %3802 = vrcp.f32 %v885_v6 }
 0x119   : > { %v3789_v10 = vpop.eup %3788  ;;  %v927_v11 = vmul.f32 %v3787_v8, %v4334_v63 }
 0x11a   : > { %v3791_v12 = vpop.eup %3790  ;;  %v930_v18 = vmul.f32 %v3789_v10, %v4339_v7 }
 0x11b   : > { %v3793_v13 = vpop.eup %3792  ;;  %v888_v55 = vadd.f32 1.0, %v3791_v12  ;;  %3249 = vmatprep.mubr.f32.mxu1 %v927_v11 }
 0x11c   : > { %v3795_v14 = vpop.eup %3794  ;;  %v887_v15 = vadd.f32 1.0, %v3793_v13  ;;  %3250 = vmatmul.mubr.f32.gmra.mrb[6].mxu1 %v928_v57 }
 0x11d   : > { %v929_v16 = vmul.f32 %v3795_v14, %v4342_v9  ;;  %3804 = vrcp.f32 %v888_v55  ;;  %v3797_v20 = vpop.eup %3796 }
 0x11e   : > { %3806 = vrcp.f32 %v887_v15  ;;  %v932_v61 = vmul.f32 %v3797_v20, %v4347_v17  ;;  %v1217_v17 = vld [vmem:[%s5622_s6] sm:$0xff] }
 0x11f   : > { %3252 = vmatprep.mubr.f32.mxu1 %v929_v16 }
 0x120   : > { %v3799_v21 = vpop.eup %3798  ;;  %3253 = vmatmul.mubr.f32.gmra.mrb[8].mxu1 %v930_v18 }
 0x121   : > { %v931_v63 = vmul.f32 %v3799_v21, %v4350_v19  ;;  %v3801_v22 = vpop.eup %3800  ;;  %v1218_v19 = vld [vmem:[%s5622_s6 + $0x8] sm:$0xff] }
 0x122   : > { %v3803_v23 = vpop.eup %3802  ;;  %v934_v9 = vmul.f32 %v3801_v22, %v4355_v27  ;;  %v1219_v27 = vld [vmem:[%s5622_s6 + $0x10] sm:$0xff] }
 0x123   : > { %3255 = vmatprep.mubr.f32.mxu1 %v931_v63  ;;  %v933_v24 = vmul.f32 %v3803_v23, %v4358_v29  ;;  %v3576_v29 = vpack.c.bf16 %v1218_v19, %v1217_v17  ;;  %v3580_v31 = vpack.c.bf16 %v1220_v30, %v1219_v27 }
 0x124   : > { %3256 = vmatmul.mubr.f32.gmra.mrb[10].mxu1 %v932_v61 }
 0x125   : > { %3258 = vmatprep.mubr.f32.mxu1 %v933_v24  ;;  %3577 = vmatprep.subr.bf16.mxu0 %v3576_v29 }
 0x126   : > { %3579 = vmatpush3.bf16.msra.mxu0 %v3576_v29 }
 0x127   : > { %v3805_v25 = vpop.eup %3804  ;;  %3581 = vmatprep.subr.bf16.mxu0 %v3580_v31 }
 0x128   : > { %v3807_v7 = vpop.eup %3806  ;;  %3259 = vmatmul.mubr.f32.gmra.mrb[12].mxu1 %v934_v9  ;;  %v936_v28 = vmul.f32 %v3805_v25, %v4363_v37  ;;  %v3588_v37 = vpack.c.bf16 %v1224_v36, %v1223_v35 }
 0x129   : > { %v935_v26 = vmul.f32 %v3807_v7, %v4366_v40  ;;  %v3592_v40 = vpack.c.bf16 %v1226_v39, %v1225_v38 }
 0x12a   : > { %3583 = vmatpush3.bf16.msra.mxu0 %v3580_v31 }
 0x12b   : > { %3261 = vmatprep.mubr.f32.mxu1 %v935_v26  ;;  %3585 = vmatprep.subr.bf16.mxu0 %v3584_v34 }
 0x12c   : > { %3262 = vmatmul.mubr.f32.gmra.mrb[14].mxu1 %v936_v28 }
 0x12e   : > { %3587 = vmatpush3.bf16.msra.mxu0 %v3584_v34 }
 0x12f   : > { %3589 = vmatprep.subr.bf16.mxu0 %v3588_v37 }
 0x132   : > { %3591 = vmatpush3.bf16.msra.mxu0 %v3588_v37 }
 0x133   : > { %3593 = vmatprep.subr.bf16.mxu0 %v3592_v40 }
 0x136   : > { %3595 = vmatpush3.bf16.msra.mxu0 %v3592_v40 }
 0x137   : > { %3597 = vmatprep.subr.bf16.mxu0 %v3596_v46 }
 0x13a   : > { %3599 = vmatpush3.bf16.msra.mxu0 %v3596_v46 }
 0x13b   : > { %3601 = vmatprep.subr.bf16.mxu0 %v3600_v50 }
 0x13e   : > { %3603 = vmatpush3.bf16.msra.mxu0 %v3600_v50 }
 0x13f   : > { %3605 = vmatprep.subr.bf16.mxu0 %v3604_v54 }
 0x142   : > { %3607 = vmatpush3.bf16.msra.mxu0 %v3604_v54 }
 0x1e1   : > { %v3242_v56 = vpop.f32.mrb[0].mxu1 }
 0x1e2   : > { %v4440_v45 = vadd.f32 %v3242_v56, %v4437_v41  ;;  %v1026_v43 = vpop.f32.mrb[1].mxu1 }
 0x1e3   : > { %v4443_v58 = vadd.f32 %v4437_v41, %v1026_v43 }
 0x1e4   : > { %v2919_v59 = vmul.f32 -1.442695, %v4440_v45 }
 0x1e5   : > { %v2918_v60 = vmul.f32 -1.442695, %v4443_v58  ;;  %v3245_v62 = vpop.f32.mrb[2].mxu1 }
 0x1e6   : > { %3808 = vpow2.f32 %v2919_v59  ;;  %v4448_v0 = vadd.f32 %v3245_v62, %v4437_v41  ;;  %v1036_v1 = vpop.f32.mrb[3].mxu1 }
 0x1e7   : > { %3810 = vpow2.f32 %v2918_v60  ;;  %v4451_v2 = vadd.f32 %v4437_v41, %v1036_v1 }
 0x1e8   : > { %v2921_v3 = vmul.f32 -1.442695, %v4448_v0 }
 0x1e9   : > { %v2920_v51 = vmul.f32 -1.442695, %v4451_v2  ;;  %v3248_v4 = vpop.f32.mrb[4].mxu1 }
 0x1ea   : > { %3812 = vpow2.f32 %v2921_v3  ;;  %v4456_v49 = vadd.f32 %v3248_v4, %v4437_v41  ;;  %v1046_v5 = vpop.f32.mrb[5].mxu1 }
 0x1eb   : > { %3814 = vpow2.f32 %v2920_v51  ;;  %v4459_v6 = vadd.f32 %v4437_v41, %v1046_v5 }
 0x1ec   : > { %v2923_v8 = vmul.f32 -1.442695, %v4456_v49 }
 0x1ed   : > { %v2922_v10 = vmul.f32 -1.442695, %v4459_v6 }
 0x1ee   : > { %3816 = vpow2.f32 %v2923_v8 }
 0x1ef   : > { %3818 = vpow2.f32 %v2922_v10  ;;  %v3251_v11 = vpop.f32.mrb[6].mxu1 }
 0x1f0   : > { %v3809_v12 = vpop.eup %3808  ;;  %v4464_v57 = vadd.f32 %v3251_v11, %v4437_v41  ;;  %v1056_v13 = vpop.f32.mrb[7].mxu1 }
 0x1f1   : > { %v3811_v55 = vpop.eup %3810  ;;  %v1154_v14 = vadd.f32 1.0, %v3809_v12  ;;  %v4467_v15 = vadd.f32 %v4437_v41, %v1056_v13 }
 0x1f2   : > { %v1153_v16 = vadd.f32 1.0, %v3811_v55  ;;  %v2925_v18 = vmul.f32 -1.442695, %v4464_v57 }
 0x1f3   : > { %3820 = vrcp.f32 %v1154_v14  ;;  %v2924_v20 = vmul.f32 -1.442695, %v4467_v15  ;;  %v3254_v21 = vpop.f32.mrb[8].mxu1 }
 0x1f4   : > { %v3813_v63 = vpop.eup %3812  ;;  %3822 = vrcp.f32 %v1153_v16  ;;  %v4472_v22 = vadd.f32 %v3254_v21, %v4437_v41  ;;  %v1066_v61 = vpop.f32.mrb[9].mxu1 }
 0x1f5   : > { %v3815_v23 = vpop.eup %3814  ;;  %v1156_v24 = vadd.f32 1.0, %v3813_v63  ;;  %3824 = vpow2.f32 %v2925_v18  ;;  %v4475_v9 = vadd.f32 %v4437_v41, %v1066_v61 }
 0x1f6   : > { %v1155_v25 = vadd.f32 1.0, %v3815_v23  ;;  %3826 = vpow2.f32 %v2924_v20  ;;  %v2927_v7 = vmul.f32 -1.442695, %v4472_v22 }
 0x1f7   : > { %3828 = vrcp.f32 %v1156_v24  ;;  %v2926_v26 = vmul.f32 -1.442695, %v4475_v9  ;;  %v3257_v28 = vpop.f32.mrb[10].mxu1 }
 0x1f8   : > { %v3817_v17 = vpop.eup %3816  ;;  %3830 = vrcp.f32 %v1155_v25  ;;  %v4480_v19 = vadd.f32 %v3257_v28, %v4437_v41  ;;  %v1076_v29 = vpop.f32.mrb[11].mxu1 }
 0x1f9   : > { %v3819_v27 = vpop.eup %3818  ;;  %v1158_v30 = vadd.f32 1.0, %v3817_v17  ;;  %3832 = vpow2.f32 %v2927_v7  ;;  %v4483_v31 = vadd.f32 %v4437_v41, %v1076_v29 }
 0x1fa   : > { %v1157_v32 = vadd.f32 1.0, %v3819_v27  ;;  %3834 = vpow2.f32 %v2926_v26  ;;  %v2929_v33 = vmul.f32 -1.442695, %v4480_v19 }
 0x1fb   : > { %3836 = vrcp.f32 %v1158_v30  ;;  %v2928_v34 = vmul.f32 -1.442695, %v4483_v31  ;;  %v3260_v35 = vpop.f32.mrb[12].mxu1 }
 0x1fc   : > { %3838 = vrcp.f32 %v1157_v32  ;;  %v4488_v36 = vadd.f32 %v3260_v35, %v4437_v41  ;;  %v1086_v37 = vpop.f32.mrb[13].mxu1 }
 0x1fd   : > { %v3821_v38 = vpop.eup %3820  ;;  %3840 = vpow2.f32 %v2929_v33  ;;  %v4491_v39 = vadd.f32 %v4437_v41, %v1086_v37 }
 0x1fe   : > { %v3823_v40 = vpop.eup %3822  ;;  %3842 = vpow2.f32 %v2928_v34  ;;  %v2931_v42 = vmul.f32 -1.442695, %v4488_v36  ;;  %v1202_v52 = vmul.f32 %v3821_v38, %v4440_v45 }
 0x1ff   : > { %v3825_v44 = vpop.eup %3824  ;;  %v1201_v46 = vmul.f32 %v3823_v40, %v4443_v58  ;;  %v2930_v47 = vmul.f32 -1.442695, %v4491_v39  ;;  %v3263_v48 = vpop.f32.mrb[14].mxu1 }
 0x200   : > { %v3827_v50 = vpop.eup %3826  ;;  %v1160_v53 = vadd.f32 1.0, %v3825_v44  ;;  %3844 = vpow2.f32 %v2931_v42  ;;  %v4498_v54 = vadd.f32 %v3263_v48, %v4437_v41  ;;  %v1096_v56 = vpop.f32.mrb[15].mxu1  ;;  %v1501_v42 = vld [vmem:[%s5624_s8 + $0x20] sm:$0xff]  ;;  %v1502_v44 = vld [vmem:[%s5624_s8 + $0x28] sm:$0xff]  ;;  %v1504_v48 = vld [vmem:[%s5624_s8 + $0x38] sm:$0xff] }
 0x201   : > { %v3829_v43 = vpop.eup %3828  ;;  %v1159_v59 = vadd.f32 1.0, %v3827_v50  ;;  %3846 = vpow2.f32 %v2930_v47  ;;  %v4501_v60 = vadd.f32 %v4437_v41, %v1096_v56  ;;  %3296 = vmatprep.mubr.f32.mxu0 %v1201_v46  ;;  %v3616_v46 = vpack.c.bf16 %v1502_v44, %v1501_v42  ;;  %v1503_v47 = vld [vmem:[%s5624_s8 + $0x30] sm:$0xff] }
 0x202   : > { %v3831_v58 = vpop.eup %3830  ;;  %3848 = vrcp.f32 %v1160_v53  ;;  %v2933_v62 = vmul.f32 -1.442695, %v4498_v54  ;;  %3297 = vmatmul.mubr.f32.vlgmr.msra.gmra.mrb[16].mxu0 %v1202_v52  ;;  %v1204_v4 = vmul.f32 %v3829_v43, %v4448_v0  ;;  %v3620_v50 = vpack.c.bf16 %v1504_v48, %v1503_v47  ;;  %v1505_v52 = vld [vmem:[%s5624_s8 + $0x40] sm:$0xff]  ;;  %v1506_v53 = vld [vmem:[%s5624_s8 + $0x48] sm:$0xff]  ;;  %v1507_v56 = vld [vmem:[%s5624_s8 + $0x50] sm:$0xff] }
 0x203   : > { %v3833_v1 = vpop.eup %3832  ;;  %v1203_v45 = vmul.f32 %v3831_v58, %v4451_v2  ;;  %3850 = vrcp.f32 %v1159_v59  ;;  %v2932_v3 = vmul.f32 -1.442695, %v4501_v60  ;;  %v1508_v43 = vld [vmem:[%s5624_s8 + $0x58] sm:$0xff]  ;;  %v1510_v58 = vld [vmem:[%s5624_s8 + $0x68] sm:$0xff] }
 0x204   : > { %v3835_v51 = vpop.eup %3834  ;;  %v1162_v5 = vadd.f32 1.0, %v3833_v1  ;;  %3852 = vpow2.f32 %v2933_v62  ;;  %v3628_v59 = vpack.c.bf16 %v1508_v43, %v1507_v56  ;;  %v1511_v1 = vld [vmem:[%s5624_s8 + $0x70] sm:$0xff] }
 0x205   : > { %v3837_v8 = vpop.eup %3836  ;;  %v1161_v41 = vadd.f32 1.0, %v3835_v51  ;;  %3854 = vpow2.f32 %v2932_v3  ;;  %3299 = vmatprep.mubr.f32.mxu0 %v1203_v45  ;;  %v1512_v45 = vld [vmem:[%s5624_s8 + $0x78] sm:$0xff]  ;;  %v4570_v51 = vld [vmem:[%s5623_s7] ss:$0 sm:$0xff] }
 0x206   : > { %v3839_v10 = vpop.eup %3838  ;;  %3856 = vrcp.f32 %v1162_v5  ;;  %3300 = vmatmul.mubr.f32.gmra.mrb[18].mxu0 %v1204_v4  ;;  %v1206_v13 = vmul.f32 %v3837_v8, %v4456_v49  ;;  %v3636_v3 = vpack.c.bf16 %v1512_v45, %v1511_v1 }
 0x207   : > { %v3841_v11 = vpop.eup %3840  ;;  %v1205_v12 = vmul.f32 %v3839_v10, %v4459_v6  ;;  %3858 = vrcp.f32 %v1161_v41 }
 0x208   : > { %v3843_v2 = vpop.eup %3842  ;;  %v1164_v55 = vadd.f32 1.0, %v3841_v11 }
 0x209   : > { %v1163_v14 = vadd.f32 1.0, %v3843_v2  ;;  %3302 = vmatprep.mubr.f32.mxu0 %v1205_v12 }
 0x20a   : > { %v3845_v0 = vpop.eup %3844  ;;  %3860 = vrcp.f32 %v1164_v55  ;;  %3303 = vmatmul.mubr.f32.gmra.mrb[20].mxu0 %v1206_v13 }
 0x20b   : > { %v3847_v16 = vpop.eup %3846  ;;  %3862 = vrcp.f32 %v1163_v14  ;;  %v1166_v18 = vadd.f32 1.0, %v3845_v0 }
 0x20c   : > { %v3849_v20 = vpop.eup %3848  ;;  %v1165_v21 = vadd.f32 1.0, %v3847_v16 }
 0x20d   : > { %v3851_v63 = vpop.eup %3850  ;;  %3864 = vrcp.f32 %v1166_v18  ;;  %v1208_v49 = vmul.f32 %v3849_v20, %v4464_v57 }
 0x20e   : > { %v3853_v61 = vpop.eup %3852  ;;  %v1207_v6 = vmul.f32 %v3851_v63, %v4467_v15  ;;  %3866 = vrcp.f32 %v1165_v21 }
 0x20f   : > { %v3855_v23 = vpop.eup %3854  ;;  %v1168_v24 = vadd.f32 1.0, %v3853_v61 }
 0x210   : > { %v3857_v25 = vpop.eup %3856  ;;  %v1167_v7 = vadd.f32 1.0, %v3855_v23  ;;  %3305 = vmatprep.mubr.f32.mxu0 %v1207_v6 }
 0x211   : > { %v3859_v26 = vpop.eup %3858  ;;  %3868 = vrcp.f32 %v1168_v24  ;;  %3306 = vmatmul.mubr.f32.gmra.mrb[22].mxu0 %v1208_v49  ;;  %v1210_v17 = vmul.f32 %v3857_v25, %v4472_v22 }
 0x212   : > { %v1209_v28 = vmul.f32 %v3859_v26, %v4475_v9  ;;  %3870 = vrcp.f32 %v1167_v7 }
 0x214   : > { %v3861_v29 = vpop.eup %3860  ;;  %3308 = vmatprep.mubr.f32.mxu0 %v1209_v28 }
 0x215   : > { %v3863_v27 = vpop.eup %3862  ;;  %3309 = vmatmul.mubr.f32.gmra.mrb[24].mxu0 %v1210_v17  ;;  %v1212_v57 = vmul.f32 %v3861_v29, %v4480_v19  ;;  %v1497_v19 = vld [vmem:[%s5624_s8] sm:$0xff] }
 0x216   : > { %v1211_v15 = vmul.f32 %v3863_v27, %v4483_v31  ;;  %v1498_v31 = vld [vmem:[%s5624_s8 + $0x8] sm:$0xff] }
 0x217   : > { %v3865_v30 = vpop.eup %3864  ;;  %v3608_v38 = vpack.c.bf16 %v1498_v31, %v1497_v19 }
 0x218   : > { %v3867_v32 = vpop.eup %3866  ;;  %3311 = vmatprep.mubr.f32.mxu0 %v1211_v15  ;;  %v1214_v9 = vmul.f32 %v3865_v30, %v4488_v36  ;;  %v1499_v36 = vld [vmem:[%s5624_s8 + $0x10] sm:$0xff] }
 0x219   : > { %v1213_v33 = vmul.f32 %v3867_v32, %v4491_v39  ;;  %3312 = vmatmul.mubr.f32.gmra.mrb[26].mxu0 %v1212_v57  ;;  %3609 = vmatprep.subr.bf16.mxu1 %v3608_v38  ;;  %v1500_v39 = vld [vmem:[%s5624_s8 + $0x18] sm:$0xff] }
 0x21a   : > { %3611 = vmatpush3.bf16.msra.mxu1 %v3608_v38  ;;  %v3612_v40 = vpack.c.bf16 %v1500_v39, %v1499_v36 }
 0x21b   : > { %v3869_v34 = vpop.eup %3868  ;;  %3314 = vmatprep.mubr.f32.mxu0 %v1213_v33 }
 0x21c   : > { %v3871_v35 = vpop.eup %3870  ;;  %v1216_v37 = vmul.f32 %v3869_v34, %v4498_v54  ;;  %3613 = vmatprep.subr.bf16.mxu1 %v3612_v40  ;;  %v3624_v54 = vpack.c.bf16 %v1506_v53, %v1505_v52 }
 0x21d   : > { %v1215_v22 = vmul.f32 %v3871_v35, %v4501_v60  ;;  %3315 = vmatmul.mubr.f32.gmra.mrb[28].mxu0 %v1214_v9  ;;  %v1509_v60 = vld [vmem:[%s5624_s8 + $0x60] sm:$0xff] }
 0x21e   : > { %3615 = vmatpush3.bf16.msra.mxu1 %v3612_v40  ;;  %v3632_v62 = vpack.c.bf16 %v1510_v58, %v1509_v60 }
 0x21f   : > { %3317 = vmatprep.mubr.f32.mxu0 %v1215_v22  ;;  %3617 = vmatprep.subr.bf16.mxu1 %v3616_v46 }
 0x221   : > { %3318 = vmatmul.mubr.f32.gmra.mrb[30].mxu0 %v1216_v37 }
 0x222   : > { %3619 = vmatpush3.bf16.msra.mxu1 %v3616_v46 }
 0x223   : > { %3621 = vmatprep.subr.bf16.mxu1 %v3620_v50 }
 0x226   : > { %3623 = vmatpush3.bf16.msra.mxu1 %v3620_v50 }
 0x227   : > { %3625 = vmatprep.subr.bf16.mxu1 %v3624_v54 }
 0x22a   : > { %3627 = vmatpush3.bf16.msra.mxu1 %v3624_v54 }
 0x22b   : > { %3629 = vmatprep.subr.bf16.mxu1 %v3628_v59 }
 0x22e   : > { %3631 = vmatpush3.bf16.msra.mxu1 %v3628_v59 }
 0x22f   : > { %3633 = vmatprep.subr.bf16.mxu1 %v3632_v62 }
 0x232   : > { %3635 = vmatpush3.bf16.msra.mxu1 %v3632_v62 }
 0x233   : > { %3637 = vmatprep.subr.bf16.mxu1 %v3636_v3 }
 0x236   : > { %3639 = vmatpush3.bf16.msra.mxu1 %v3636_v3 }
 0x2d5   : > { %v3298_v4 = vpop.f32.mrb[16].mxu0 }
 0x2d6   : > { %v4573_v5 = vadd.f32 %v3298_v4, %v4570_v51  ;;  %v1306_v8 = vpop.f32.mrb[17].mxu0 }
 0x2d7   : > { %v4576_v41 = vadd.f32 %v4570_v51, %v1306_v8 }
 0x2d8   : > { %v2936_v10 = vmul.f32 -1.442695, %v4573_v5 }
 0x2d9   : > { %v2935_v11 = vmul.f32 -1.442695, %v4576_v41  ;;  %v3301_v12 = vpop.f32.mrb[18].mxu0 }
 0x2da   : > { %3872 = vpow2.f32 %v2936_v10  ;;  %v4581_v2 = vadd.f32 %v3301_v12, %v4570_v51  ;;  %v1316_v13 = vpop.f32.mrb[19].mxu0 }
 0x2db   : > { %3874 = vpow2.f32 %v2935_v11  ;;  %v4584_v55 = vadd.f32 %v4570_v51, %v1316_v13 }
 0x2dc   : > { %v2938_v14 = vmul.f32 -1.442695, %v4581_v2 }
 0x2dd   : > { %v2937_v0 = vmul.f32 -1.442695, %v4584_v55  ;;  %v3304_v16 = vpop.f32.mrb[20].mxu0 }
 0x2de   : > { %3876 = vpow2.f32 %v2938_v14  ;;  %v4589_v18 = vadd.f32 %v3304_v16, %v4570_v51  ;;  %v1326_v20 = vpop.f32.mrb[21].mxu0 }
 0x2df   : > { %3878 = vpow2.f32 %v2937_v0  ;;  %v4592_v21 = vadd.f32 %v4570_v51, %v1326_v20 }
 0x2e0   : > { %v2940_v63 = vmul.f32 -1.442695, %v4589_v18 }
 0x2e1   : > { %v2939_v61 = vmul.f32 -1.442695, %v4592_v21 }
 0x2e2   : > { %3880 = vpow2.f32 %v2940_v63 }
 0x2e3   : > { %3882 = vpow2.f32 %v2939_v61 }
 0x2e4   : > { %v3873_v6 = vpop.eup %3872  ;;  %v3307_v23 = vpop.f32.mrb[22].mxu0 }
 0x2e5   : > { %v3875_v49 = vpop.eup %3874  ;;  %v1434_v24 = vadd.f32 1.0, %v3873_v6  ;;  %v4597_v25 = vadd.f32 %v3307_v23, %v4570_v51  ;;  %v1336_v7 = vpop.f32.mrb[23].mxu0 }
 0x2e6   : > { %v1433_v26 = vadd.f32 1.0, %v3875_v49  ;;  %v4600_v28 = vadd.f32 %v4570_v51, %v1336_v7 }
 0x2e7   : > { %3884 = vrcp.f32 %v1434_v24  ;;  %v2942_v17 = vmul.f32 -1.442695, %v4597_v25 }
 0x2e8   : > { %v3877_v29 = vpop.eup %3876  ;;  %3886 = vrcp.f32 %v1433_v26  ;;  %v2941_v27 = vmul.f32 -1.442695, %v4600_v28  ;;  %v3310_v15 = vpop.f32.mrb[24].mxu0 }
 0x2e9   : > { %v3879_v30 = vpop.eup %3878  ;;  %v1436_v57 = vadd.f32 1.0, %v3877_v29  ;;  %3888 = vpow2.f32 %v2942_v17  ;;  %v4605_v32 = vadd.f32 %v3310_v15, %v4570_v51  ;;  %v1346_v33 = vpop.f32.mrb[25].mxu0 }
 0x2ea   : > { %v1435_v34 = vadd.f32 1.0, %v3879_v30  ;;  %3890 = vpow2.f32 %v2941_v27  ;;  %v4608_v9 = vadd.f32 %v4570_v51, %v1346_v33 }
 0x2eb   : > { %3892 = vrcp.f32 %v1436_v57  ;;  %v2944_v35 = vmul.f32 -1.442695, %v4605_v32 }
 0x2ec   : > { %v3881_v22 = vpop.eup %3880  ;;  %3894 = vrcp.f32 %v1435_v34  ;;  %v2943_v37 = vmul.f32 -1.442695, %v4608_v9  ;;  %v3313_v19 = vpop.f32.mrb[26].mxu0 }
 0x2ed   : > { %v3883_v31 = vpop.eup %3882  ;;  %v1438_v38 = vadd.f32 1.0, %v3881_v22  ;;  %3896 = vpow2.f32 %v2944_v35  ;;  %v4613_v36 = vadd.f32 %v3313_v19, %v4570_v51  ;;  %v1356_v39 = vpop.f32.mrb[27].mxu0 }
 0x2ee   : > { %v1437_v40 = vadd.f32 1.0, %v3883_v31  ;;  %3898 = vpow2.f32 %v2943_v37  ;;  %v4616_v42 = vadd.f32 %v4570_v51, %v1356_v39 }
 0x2ef   : > { %3900 = vrcp.f32 %v1438_v38  ;;  %v2946_v44 = vmul.f32 -1.442695, %v4613_v36 }
 0x2f0   : > { %3902 = vrcp.f32 %v1437_v40  ;;  %v2945_v46 = vmul.f32 -1.442695, %v4616_v42  ;;  %v3316_v47 = vpop.f32.mrb[28].mxu0 }
 0x2f1   : > { %v3885_v48 = vpop.eup %3884  ;;  %3904 = vpow2.f32 %v2946_v44  ;;  %v4621_v50 = vadd.f32 %v3316_v47, %v4570_v51  ;;  %v1366_v52 = vpop.f32.mrb[29].mxu0 }
 0x2f2   : > { %v3887_v53 = vpop.eup %3886  ;;  %3906 = vpow2.f32 %v2945_v46  ;;  %v4624_v54 = vadd.f32 %v4570_v51, %v1366_v52  ;;  %v1482_v58 = vmul.f32 %v3885_v48, %v4573_v5 }
 0x2f3   : > { %v3889_v56 = vpop.eup %3888  ;;  %v1481_v43 = vmul.f32 %v3887_v53, %v4576_v41  ;;  %v2948_v59 = vmul.f32 -1.442695, %v4621_v50  ;;  %v1778_v53 = vld [vmem:[%s5626_s10 + $0x8] sm:$0xff] }
 0x2f4   : > { %v3891_v60 = vpop.eup %3890  ;;  %v1440_v62 = vadd.f32 1.0, %v3889_v56  ;;  %v2947_v1 = vmul.f32 -1.442695, %v4624_v54  ;;  %v3319_v45 = vpop.f32.mrb[30].mxu0  ;;  %v1947_v56 = vld [vmem:[%s5628_s12 + $0x10] sm:$0xff] }
 0x2f5   : > { %v3893_v3 = vpop.eup %3892  ;;  %v1439_v4 = vadd.f32 1.0, %v3891_v60  ;;  %3908 = vpow2.f32 %v2948_v59  ;;  %v4631_v8 = vadd.f32 %v3319_v45, %v4570_v51  ;;  %v1376_v10 = vpop.f32.mrb[31].mxu0  ;;  %3352 = vmatprep.mubr.f32.mxu1 %v1481_v43  ;;  %v1948_v43 = vld [vmem:[%s5628_s12 + $0x18] sm:$0xff]  ;;  %v1779_v59 = vld [vmem:[%s5626_s10 + $0x10] sm:$0xff]  ;;  %v1950_v45 = vld [vmem:[%s5628_s12 + $0x28] sm:$0xff] }
 0x2f6   : > { %v3895_v11 = vpop.eup %3894  ;;  %3910 = vrcp.f32 %v1440_v62  ;;  %v4634_v41 = vadd.f32 %v4570_v51, %v1376_v10  ;;  %3353 = vmatmul.mubr.f32.vlgmr.msra.gmra.mrb[16].mxu1 %v1482_v58  ;;  %v1484_v0 = vmul.f32 %v3893_v3, %v4581_v2  ;;  %v3676_v60 = vpack.c.bf16 %v1948_v43, %v1947_v56  ;;  %v1780_v58 = vld [vmem:[%s5626_s10 + $0x18] sm:$0xff]  ;;  %v1781_v3 = vld [vmem:[%s5626_s10 + $0x20] sm:$0xff] }
 0x2f7   : > { %v3897_v12 = vpop.eup %3896  ;;  %v1483_v5 = vmul.f32 %v3895_v11, %v4584_v55  ;;  %3912 = vrcp.f32 %v1439_v4  ;;  %v2950_v13 = vmul.f32 -1.442695, %v4631_v8  ;;  %v3644_v62 = vpack.c.bf16 %v1780_v58, %v1779_v59  ;;  %v1951_v11 = vld [vmem:[%s5628_s12 + $0x30] sm:$0xff] }
 0x2f8   : > { %v3899_v14 = vpop.eup %3898  ;;  %v1442_v16 = vadd.f32 1.0, %v3897_v12  ;;  %3914 = vpow2.f32 %v2947_v1  ;;  %v2949_v20 = vmul.f32 -1.442695, %v4634_v41  ;;  %v1949_v1 = vld [vmem:[%s5628_s12 + $0x20] sm:$0xff]  ;;  %v1783_v12 = vld [vmem:[%s5626_s10 + $0x30] sm:$0xff] }
 0x2f9   : > { %v3901_v63 = vpop.eup %3900  ;;  %v1441_v61 = vadd.f32 1.0, %v3899_v14  ;;  %3916 = vpow2.f32 %v2950_v13  ;;  %3355 = vmatprep.mubr.f32.mxu1 %v1483_v5  ;;  %v3680_v4 = vpack.c.bf16 %v1950_v45, %v1949_v1  ;;  %v1784_v13 = vld [vmem:[%s5626_s10 + $0x38] sm:$0xff] }
 0x2fa   : > { %v3903_v51 = vpop.eup %3902  ;;  %3918 = vrcp.f32 %v1442_v16  ;;  %3356 = vmatmul.mubr.f32.gmra.mrb[18].mxu1 %v1484_v0  ;;  %v1486_v49 = vmul.f32 %v3901_v63, %v4589_v18  ;;  %v3652_v14 = vpack.c.bf16 %v1784_v13, %v1783_v12  ;;  %v1953_v0 = vld [vmem:[%s5628_s12 + $0x40] sm:$0xff]  ;;  %v1954_v16 = vld [vmem:[%s5628_s12 + $0x48] sm:$0xff] }
 0x2fb   : > { %v3905_v6 = vpop.eup %3904  ;;  %v1485_v55 = vmul.f32 %v3903_v51, %v4592_v21  ;;  %3920 = vrcp.f32 %v1441_v61  ;;  %v3688_v63 = vpack.c.bf16 %v1954_v16, %v1953_v0  ;;  %v1786_v61 = vld [vmem:[%s5626_s10 + $0x48] sm:$0xff] }
 0x2fc   : > { %v3907_v23 = vpop.eup %3906  ;;  %v1444_v24 = vadd.f32 1.0, %v3905_v6  ;;  %3922 = vpow2.f32 %v2949_v20  ;;  %v1785_v20 = vld [vmem:[%s5626_s10 + $0x40] sm:$0xff]  ;;  %v1955_v6 = vld [vmem:[%s5628_s12 + $0x50] sm:$0xff] }
 0x2fd   : > { %v1443_v2 = vadd.f32 1.0, %v3907_v23  ;;  %3358 = vmatprep.mubr.f32.mxu1 %v1485_v55  ;;  %v3656_v51 = vpack.c.bf16 %v1786_v61, %v1785_v20  ;;  %v1956_v55 = vld [vmem:[%s5628_s12 + $0x58] sm:$0xff]  ;;  %v1787_v23 = vld [vmem:[%s5626_s10 + $0x50] sm:$0xff] }
 0x2fe   : > { %3924 = vrcp.f32 %v1444_v24  ;;  %3359 = vmatmul.mubr.f32.gmra.mrb[20].mxu1 %v1486_v49  ;;  %v3692_v49 = vpack.c.bf16 %v1956_v55, %v1955_v6  ;;  %v1788_v24 = vld [vmem:[%s5626_s10 + $0x58] sm:$0xff] }
 0x2ff   : > { %v3909_v7 = vpop.eup %3908  ;;  %3926 = vrcp.f32 %v1443_v2  ;;  %v3660_v2 = vpack.c.bf16 %v1788_v24, %v1787_v23 }
 0x300   : > { %v3911_v26 = vpop.eup %3910  ;;  %v1446_v17 = vadd.f32 1.0, %v3909_v7  ;;  %v1957_v7 = vld [vmem:[%s5628_s12 + $0x60] sm:$0xff] }
 0x301   : > { %v3913_v29 = vpop.eup %3912  ;;  %v1488_v21 = vmul.f32 %v3911_v26, %v4597_v25  ;;  %v1958_v26 = vld [vmem:[%s5628_s12 + $0x68] sm:$0xff] }
 0x302   : > { %v3915_v27 = vpop.eup %3914  ;;  %v1487_v15 = vmul.f32 %v3913_v29, %v4600_v28  ;;  %3928 = vrcp.f32 %v1446_v17  ;;  %v1789_v17 = vld [vmem:[%s5626_s10 + $0x60] sm:$0xff]  ;;  %v3696_v29 = vpack.c.bf16 %v1958_v26, %v1957_v7  ;;  %v2115_v26 = vld [vmem:[%s5630_s14 + $0x10] sm:$0xff] }
 0x303   : > { %v3917_v30 = vpop.eup %3916  ;;  %v1445_v57 = vadd.f32 1.0, %v3915_v27  ;;  %v1790_v27 = vld [vmem:[%s5626_s10 + $0x68] sm:$0xff] }
 0x304   : > { %v3919_v33 = vpop.eup %3918  ;;  %v1448_v18 = vadd.f32 1.0, %v3917_v30  ;;  %3361 = vmatprep.mubr.f32.mxu1 %v1487_v15  ;;  %v3664_v15 = vpack.c.bf16 %v1790_v27, %v1789_v17  ;;  %v1959_v30 = vld [vmem:[%s5628_s12 + $0x70] sm:$0xff]  ;;  %v2116_v17 = vld [vmem:[%s5630_s14 + $0x18] sm:$0xff] }
 0x305   : > { %v3921_v34 = vpop.eup %3920  ;;  %3930 = vrcp.f32 %v1445_v57  ;;  %3362 = vmatmul.mubr.f32.gmra.mrb[22].mxu1 %v1488_v21  ;;  %v1490_v37 = vmul.f32 %v3919_v33, %v4605_v32  ;;  %v1960_v21 = vld [vmem:[%s5628_s12 + $0x78] sm:$0xff]  ;;  %v1791_v57 = vld [vmem:[%s5626_s10 + $0x70] sm:$0xff] }
 0x306   : > { %v3923_v35 = vpop.eup %3922  ;;  %v1489_v22 = vmul.f32 %v3921_v34, %v4608_v9  ;;  %3932 = vrcp.f32 %v1448_v18  ;;  %v3700_v33 = vpack.c.bf16 %v1960_v21, %v1959_v30  ;;  %v1792_v18 = vld [vmem:[%s5626_s10 + $0x78] sm:$0xff] }
 0x307   : > { %v1447_v19 = vadd.f32 1.0, %v3923_v35  ;;  %v3668_v34 = vpack.c.bf16 %v1792_v18, %v1791_v57  ;;  %v2113_v35 = vld [vmem:[%s5630_s14] sm:$0xff] }
 0x308   : > { %v3925_v31 = vpop.eup %3924  ;;  %3364 = vmatprep.mubr.f32.mxu1 %v1489_v22  ;;  %v2114_v22 = vld [vmem:[%s5630_s14 + $0x8] sm:$0xff] }
 0x309   : > { %v3927_v28 = vpop.eup %3926  ;;  %3934 = vrcp.f32 %v1447_v19  ;;  %3365 = vmatmul.mubr.f32.gmra.mrb[24].mxu1 %v1490_v37  ;;  %v1492_v38 = vmul.f32 %v3925_v31, %v4613_v36  ;;  %v1945_v36 = vld [vmem:[%s5628_s12] sm:$0xff]  ;;  %v4754_v37 = vpack.c.bf16 %v2114_v22, %v2113_v35  ;;  %v3708_v22 = vpack.c.bf16 %v2116_v17, %v2115_v26 }
 0x30a   : > { %v1491_v25 = vmul.f32 %v3927_v28, %v4616_v42  ;;  %v1946_v42 = vld [vmem:[%s5628_s12 + $0x8] sm:$0xff]  ;;  %v4760_v19 = vld [vmem:[%s5625_s9] ss:$0 sm:$0xff] }
 0x30b   : > { %v3672_v52 = vpack.c.bf16 %v1946_v42, %v1945_v36 }
 0x30c   : > { %3367 = vmatprep.mubr.f32.mxu1 %v1491_v25  ;;  %v3929_v39 = vpop.eup %3928 }
 0x30d   : > { %3368 = vmatmul.mubr.f32.gmra.mrb[26].mxu1 %v1492_v38  ;;  %v1494_v9 = vmul.f32 %v3929_v39, %v4621_v50  ;;  %v1777_v50 = vld [vmem:[%s5626_s10] sm:$0xff]  ;;  %3673 = vmatprep.subr.bf16.mxu1 %v3672_v52 }
 0x30e   : > { %3675 = vmatpush3.bf16.msra.mxu1 %v3672_v52 }
 0x30f   : > { %v3931_v40 = vpop.eup %3930  ;;  %3677 = vmatprep.subr.bf16.mxu1 %v3676_v60 }
 0x310   : > { %v1493_v44 = vmul.f32 %v3931_v40, %v4624_v54  ;;  %v3933_v32 = vpop.eup %3932  ;;  %v3640_v54 = vpack.c.bf16 %v1778_v53, %v1777_v50 }
 0x311   : > { %v1496_v48 = vmul.f32 %v3933_v32, %v4631_v8  ;;  %v1782_v8 = vld [vmem:[%s5626_s10 + $0x28] sm:$0xff] }
 0x312   : > { %3370 = vmatprep.mubr.f32.mxu1 %v1493_v44  ;;  %3641 = vmatprep.subr.bf16.mxu0 %v3640_v54  ;;  %v3648_v10 = vpack.c.bf16 %v1782_v8, %v1781_v3 }
 0x313   : > { %v3935_v46 = vpop.eup %3934  ;;  %3371 = vmatmul.mubr.f32.gmra.mrb[28].mxu1 %v1494_v9  ;;  %3643 = vmatpush3.bf16.msra.mxu0 %v3640_v54 }
 0x314   : > { %v1495_v47 = vmul.f32 %v3935_v46, %v4634_v41  ;;  %3645 = vmatprep.subr.bf16.mxu0 %v3644_v62  ;;  %3679 = vmatpush3.bf16.msra.mxu1 %v3676_v60  ;;  %v1952_v41 = vld [vmem:[%s5628_s12 + $0x38] sm:$0xff] }
 0x315   : > { %3681 = vmatprep.subr.bf16.mxu1 %v3680_v4  ;;  %v3684_v5 = vpack.c.bf16 %v1952_v41, %v1951_v11 }
 0x316   : > { %3373 = vmatprep.mubr.f32.mxu1 %v1495_v47 }
 0x317   : > { %3374 = vmatmul.mubr.f32.gmra.mrb[30].mxu1 %v1496_v48  ;;  %3647 = vmatpush3.bf16.msra.mxu0 %v3644_v62 }
 0x318   : > { %3649 = vmatprep.subr.bf16.mxu0 %v3648_v10  ;;  %3683 = vmatpush3.bf16.msra.mxu1 %v3680_v4 }
 0x319   : > { %3685 = vmatprep.subr.bf16.mxu1 %v3684_v5 }
 0x31b   : > { %3651 = vmatpush3.bf16.msra.mxu0 %v3648_v10 }
 0x31c   : > { %3653 = vmatprep.subr.bf16.mxu0 %v3652_v14  ;;  %3687 = vmatpush3.bf16.msra.mxu1 %v3684_v5 }
 0x31d   : > { %3689 = vmatprep.subr.bf16.mxu1 %v3688_v63 }
 0x31f   : > { %3655 = vmatpush3.bf16.msra.mxu0 %v3652_v14 }
 0x320   : > { %3657 = vmatprep.subr.bf16.mxu0 %v3656_v51  ;;  %3691 = vmatpush3.bf16.msra.mxu1 %v3688_v63 }
 0x321   : > { %3693 = vmatprep.subr.bf16.mxu1 %v3692_v49 }
 0x323   : > { %3659 = vmatpush3.bf16.msra.mxu0 %v3656_v51 }
 0x324   : > { %3661 = vmatprep.subr.bf16.mxu0 %v3660_v2  ;;  %3695 = vmatpush3.bf16.msra.mxu1 %v3692_v49 }
 0x325   : > { %3697 = vmatprep.subr.bf16.mxu1 %v3696_v29 }
 0x327   : > { %3663 = vmatpush3.bf16.msra.mxu0 %v3660_v2 }
 0x328   : > { %3665 = vmatprep.subr.bf16.mxu0 %v3664_v15  ;;  %3699 = vmatpush3.bf16.msra.mxu1 %v3696_v29 }
 0x329   : > { %3701 = vmatprep.subr.bf16.mxu1 %v3700_v33 }
 0x32b   : > { %3667 = vmatpush3.bf16.msra.mxu0 %v3664_v15 }
 0x32c   : > { %3669 = vmatprep.subr.bf16.mxu0 %v3668_v34  ;;  %3703 = vmatpush3.bf16.msra.mxu1 %v3700_v33 }
 0x32f   : > { %3671 = vmatpush3.bf16.msra.mxu0 %v3668_v34 }
 0x330   : > { %3705 = vmatprep.subr.bf16.mxu0 %v4754_v37 }
 0x3c9   : > { %v3354_v31 = vpop.f32.mrb[16].mxu1 }
 0x3ca   : > { %v4763_v28 = vadd.f32 %v3354_v31, %v4760_v19  ;;  %v1586_v25 = vpop.f32.mrb[17].mxu1  ;;  %v2117_v31 = vld [vmem:[%s5630_s14 + $0x20] sm:$0xff] }
 0x3cb   : > { %v4766_v38 = vadd.f32 %v4760_v19, %v1586_v25  ;;  %v2118_v25 = vld [vmem:[%s5630_s14 + $0x28] sm:$0xff] }
 0x3cc   : > { %v2953_v39 = vmul.f32 -1.442695, %v4763_v28 }
 0x3cd   : > { %v2952_v40 = vmul.f32 -1.442695, %v4766_v38  ;;  %v3357_v44 = vpop.f32.mrb[18].mxu1 }
 0x3ce   : > { %3936 = vpow2.f32 %v2953_v39  ;;  %v4771_v9 = vadd.f32 %v3357_v44, %v4760_v19  ;;  %v1596_v32 = vpop.f32.mrb[19].mxu1 }
 0x3cf   : > { %3938 = vpow2.f32 %v2952_v40  ;;  %v4774_v46 = vadd.f32 %v4760_v19, %v1596_v32 }
 0x3d0   : > { %v2955_v47 = vmul.f32 -1.442695, %v4771_v9 }
 0x3d1   : > { %v2954_v48 = vmul.f32 -1.442695, %v4774_v46  ;;  %v3360_v36 = vpop.f32.mrb[20].mxu1 }
 0x3d2   : > { %3940 = vpow2.f32 %v2955_v47  ;;  %v4779_v42 = vadd.f32 %v3360_v36, %v4760_v19  ;;  %v1606_v50 = vpop.f32.mrb[21].mxu1 }
 0x3d3   : > { %3942 = vpow2.f32 %v2954_v48  ;;  %v4782_v52 = vadd.f32 %v4760_v19, %v1606_v50 }
 0x3d4   : > { %v2957_v53 = vmul.f32 -1.442695, %v4779_v42 }
 0x3d5   : > { %v2956_v54 = vmul.f32 -1.442695, %v4782_v52 }
 0x3d6   : > { %3944 = vpow2.f32 %v2957_v53  ;;  %v3712_v53 = vpack.c.bf16 %v2118_v25, %v2117_v31  ;;  %v2128_v31 = vld [vmem:[%s5630_s14 + $0x78] sm:$0xff] }
 0x3d7   : > { %3946 = vpow2.f32 %v2956_v54 }
 0x3d8   : > { %v3937_v56 = vpop.eup %3936  ;;  %v3363_v43 = vpop.f32.mrb[22].mxu1 }
 0x3d9   : > { %v3939_v59 = vpop.eup %3938  ;;  %v1714_v60 = vadd.f32 1.0, %v3937_v56  ;;  %v4787_v58 = vadd.f32 %v3363_v43, %v4760_v19  ;;  %v1616_v62 = vpop.f32.mrb[23].mxu1 }
 0x3da   : > { %v1713_v1 = vadd.f32 1.0, %v3939_v59  ;;  %v4790_v45 = vadd.f32 %v4760_v19, %v1616_v62 }
 0x3db   : > { %3948 = vrcp.f32 %v1714_v60  ;;  %v2959_v3 = vmul.f32 -1.442695, %v4787_v58 }
 0x3dc   : > { %v3941_v4 = vpop.eup %3940  ;;  %3950 = vrcp.f32 %v1713_v1  ;;  %v2958_v8 = vmul.f32 -1.442695, %v4790_v45  ;;  %v3366_v10 = vpop.f32.mrb[24].mxu1 }
 0x3dd   : > { %v3943_v11 = vpop.eup %3942  ;;  %v1716_v41 = vadd.f32 1.0, %v3941_v4  ;;  %3952 = vpow2.f32 %v2959_v3  ;;  %v4795_v12 = vadd.f32 %v3366_v10, %v4760_v19  ;;  %v1626_v5 = vpop.f32.mrb[25].mxu1 }
 0x3de   : > { %v1715_v13 = vadd.f32 1.0, %v3943_v11  ;;  %3954 = vpow2.f32 %v2958_v8  ;;  %v4798_v14 = vadd.f32 %v4760_v19, %v1626_v5 }
 0x3df   : > { %3956 = vrcp.f32 %v1716_v41  ;;  %v2961_v0 = vmul.f32 -1.442695, %v4795_v12 }
 0x3e0   : > { %v3945_v16 = vpop.eup %3944  ;;  %3958 = vrcp.f32 %v1715_v13  ;;  %v2960_v20 = vmul.f32 -1.442695, %v4798_v14  ;;  %v3369_v63 = vpop.f32.mrb[26].mxu1 }
 0x3e1   : > { %v3947_v61 = vpop.eup %3946  ;;  %v1718_v51 = vadd.f32 1.0, %v3945_v16  ;;  %3960 = vpow2.f32 %v2961_v0  ;;  %v4803_v6 = vadd.f32 %v3369_v63, %v4760_v19  ;;  %v1636_v55 = vpop.f32.mrb[27].mxu1 }
 0x3e2   : > { %v1717_v23 = vadd.f32 1.0, %v3947_v61  ;;  %3962 = vpow2.f32 %v2960_v20  ;;  %v4806_v49 = vadd.f32 %v4760_v19, %v1636_v55 }
 0x3e3   : > { %3964 = vrcp.f32 %v1718_v51  ;;  %v2963_v24 = vmul.f32 -1.442695, %v4803_v6 }
 0x3e4   : > { %3966 = vrcp.f32 %v1717_v23  ;;  %v2962_v2 = vmul.f32 -1.442695, %v4806_v49  ;;  %v2123_v23 = vld [vmem:[%s5630_s14 + $0x50] sm:$0xff] }
 0x3e5   : > { %v3949_v7 = vpop.eup %3948  ;;  %3968 = vpow2.f32 %v2963_v24  ;;  %v2124_v24 = vld [vmem:[%s5630_s14 + $0x58] sm:$0xff] }
 0x3e6   : > { %v3951_v29 = vpop.eup %3950  ;;  %3970 = vpow2.f32 %v2962_v2  ;;  %v3372_v27 = vpop.f32.mrb[28].mxu1  ;;  %v4823_v18 = vmul.f32 %v3949_v7, %v4763_v28  ;;  %v3724_v17 = vpack.c.bf16 %v2124_v24, %v2123_v23 }
 0x3e7   : > { %v3953_v15 = vpop.eup %3952  ;;  %v4817_v30 = vmul.f32 %v3951_v29, %v4766_v38  ;;  %v4820_v21 = vadd.f32 %v3372_v27, %v4760_v19  ;;  %v1646_v57 = vpop.f32.mrb[29].mxu1 }
 0x3e8   : > { %v3955_v33 = vpop.eup %3954  ;;  %v1720_v34 = vadd.f32 1.0, %v3953_v15  ;;  %v4826_v35 = vadd.f32 %v4760_v19, %v1646_v57  ;;  %v2125_v57 = vld [vmem:[%s5630_s14 + $0x60] sm:$0xff] }
 0x3e9   : > { %v3957_v38 = vpop.eup %3956  ;;  %v1719_v39 = vadd.f32 1.0, %v3955_v33  ;;  %v2965_v40 = vmul.f32 -1.442695, %v4820_v21  ;;  %3408 = vmatprep.mubr.f32.mxu0 %v4817_v30  ;;  %3464 = vmatprep.mubr.f32.mxu1 %v4817_v30  ;;  %v2126_v33 = vld [vmem:[%s5630_s14 + $0x68] sm:$0xff] }
 0x3ea   : > { %v3959_v28 = vpop.eup %3958  ;;  %3972 = vrcp.f32 %v1720_v34  ;;  %v2964_v44 = vmul.f32 -1.442695, %v4826_v35  ;;  %v3375_v32 = vpop.f32.mrb[30].mxu1  ;;  %3409 = vmatmul.mubr.f32.vlgmr.msra.gmra.mrb[32].mxu0 %v4823_v18  ;;  %3465 = vmatmul.mubr.f32.vlgmr.msra.gmra.mrb[32].mxu1 %v4823_v18  ;;  %v4848_v56 = vmul.f32 %v3957_v38, %v4771_v9  ;;  %v2120_v9 = vld [vmem:[%s5630_s14 + $0x38] sm:$0xff]  ;;  %v3728_v38 = vpack.c.bf16 %v2126_v33, %v2125_v57 }
 0x3eb   : > { %v3961_v47 = vpop.eup %3960  ;;  %v4841_v48 = vmul.f32 %v3959_v28, %v4774_v46  ;;  %3974 = vrcp.f32 %v1719_v39  ;;  %v4844_v36 = vadd.f32 %v3375_v32, %v4760_v19  ;;  %v1656_v50 = vpop.f32.mrb[31].mxu1  ;;  %3707 = vmatpush3.bf16.msra.mxu0 %v4754_v37  ;;  %v2119_v37 = vld [vmem:[%s5630_s14 + $0x30] sm:$0xff] }
 0x3ec   : > { %v3963_v54 = vpop.eup %3962  ;;  %v1722_v43 = vadd.f32 1.0, %v3961_v47  ;;  %3976 = vpow2.f32 %v2965_v40  ;;  %v4851_v59 = vadd.f32 %v4760_v19, %v1656_v50  ;;  %3709 = vmatprep.subr.bf16.mxu0 %v3708_v22  ;;  %v3716_v41 = vpack.c.bf16 %v2120_v9, %v2119_v37 }
 0x3ed   : > { %v3965_v46 = vpop.eup %3964  ;;  %v1721_v60 = vadd.f32 1.0, %v3963_v54  ;;  %3978 = vpow2.f32 %v2964_v44  ;;  %v2967_v62 = vmul.f32 -1.442695, %v4844_v36  ;;  %3411 = vmatprep.mubr.f32.mxu0 %v4841_v48  ;;  %3467 = vmatprep.mubr.f32.mxu1 %v4841_v48 }
 0x3ee   : > { %v3967_v19 = vpop.eup %3966  ;;  %3980 = vrcp.f32 %v1722_v43  ;;  %v2966_v1 = vmul.f32 -1.442695, %v4851_v59  ;;  %3412 = vmatmul.mubr.f32.gmra.mrb[34].mxu0 %v4848_v56  ;;  %3468 = vmatmul.mubr.f32.gmra.mrb[34].mxu1 %v4848_v56  ;;  %v4869_v10 = vmul.f32 %v3965_v46, %v4779_v42  ;;  %v2121_v42 = vld [vmem:[%s5630_s14 + $0x40] sm:$0xff] }
 0x3ef   : > { %v3969_v3 = vpop.eup %3968  ;;  %v4866_v4 = vmul.f32 %v3967_v19, %v4782_v52  ;;  %3982 = vrcp.f32 %v1721_v60  ;;  %3711 = vmatpush3.bf16.msra.mxu0 %v3708_v22  ;;  %v2122_v52 = vld [vmem:[%s5630_s14 + $0x48] sm:$0xff] }
 0x3f0   : > { %v3971_v8 = vpop.eup %3970  ;;  %v1724_v11 = vadd.f32 1.0, %v3969_v3  ;;  %3984 = vpow2.f32 %v2967_v62  ;;  %3713 = vmatprep.subr.bf16.mxu0 %v3712_v53  ;;  %v3720_v63 = vpack.c.bf16 %v2122_v52, %v2121_v42 }
 0x3f1   : > { %v1723_v5 = vadd.f32 1.0, %v3971_v8  ;;  %3986 = vpow2.f32 %v2966_v1  ;;  %3414 = vmatprep.mubr.f32.mxu0 %v4866_v4  ;;  %3470 = vmatprep.mubr.f32.mxu1 %v4866_v4 }
 0x3f2   : > { %3988 = vrcp.f32 %v1724_v11  ;;  %3415 = vmatmul.mubr.f32.gmra.mrb[36].mxu0 %v4869_v10  ;;  %3471 = vmatmul.mubr.f32.gmra.mrb[36].mxu1 %v4869_v10 }
 0x3f3   : > { %3990 = vrcp.f32 %v1723_v5  ;;  %3715 = vmatpush3.bf16.msra.mxu0 %v3712_v53 }
 0x3f4   : > { %v3973_v13 = vpop.eup %3972  ;;  %3717 = vmatprep.subr.bf16.mxu0 %v3716_v41 }
 0x3f5   : > { %v3975_v0 = vpop.eup %3974  ;;  %v4885_v51 = vmul.f32 %v3973_v13, %v4787_v58 }
 0x3f6   : > { %v3977_v16 = vpop.eup %3976  ;;  %v4882_v20 = vmul.f32 %v3975_v0, %v4790_v45 }
 0x3f7   : > { %v3979_v61 = vpop.eup %3978  ;;  %v1726_v55 = vadd.f32 1.0, %v3977_v16  ;;  %3719 = vmatpush3.bf16.msra.mxu0 %v3716_v41 }
 0x3f8   : > { %v3981_v2 = vpop.eup %3980  ;;  %v1725_v7 = vadd.f32 1.0, %v3979_v61  ;;  %3417 = vmatprep.mubr.f32.mxu0 %v4882_v20  ;;  %3473 = vmatprep.mubr.f32.mxu1 %v4882_v20 }
 0x3f9   : > { %v3983_v45 = vpop.eup %3982  ;;  %3992 = vrcp.f32 %v1726_v55  ;;  %3418 = vmatmul.mubr.f32.gmra.mrb[38].mxu0 %v4885_v51  ;;  %3474 = vmatmul.mubr.f32.gmra.mrb[38].mxu1 %v4885_v51  ;;  %v1770_v27 = vmul.f32 %v3981_v2, %v4795_v12  ;;  %v2127_v12 = vld [vmem:[%s5630_s14 + $0x70] sm:$0xff] }
 0x3fa   : > { %v3985_v58 = vpop.eup %3984  ;;  %v1769_v26 = vmul.f32 %v3983_v45, %v4798_v14  ;;  %3994 = vrcp.f32 %v1725_v7  ;;  %3721 = vmatprep.subr.bf16.mxu0 %v3720_v63  ;;  %v3732_v40 = vpack.c.bf16 %v2128_v31, %v2127_v12 }
 0x3fb   : > { %v3987_v29 = vpop.eup %3986  ;;  %v1728_v15 = vadd.f32 1.0, %v3985_v58  ;;  %3723 = vmatpush3.bf16.msra.mxu0 %v3720_v63 }
 0x3fc   : > { %v3989_v34 = vpop.eup %3988  ;;  %v1727_v22 = vadd.f32 1.0, %v3987_v29  ;;  %3420 = vmatprep.mubr.f32.mxu0 %v1769_v26  ;;  %3476 = vmatprep.mubr.f32.mxu1 %v1769_v26 }
 0x3fd   : > { %v3991_v14 = vpop.eup %3990  ;;  %3996 = vrcp.f32 %v1728_v15  ;;  %3421 = vmatmul.mubr.f32.gmra.mrb[40].mxu0 %v1770_v27  ;;  %3477 = vmatmul.mubr.f32.gmra.mrb[40].mxu1 %v1770_v27  ;;  %v1772_v39 = vmul.f32 %v3989_v34, %v4803_v6 }
 0x3fe   : > { %v1771_v25 = vmul.f32 %v3991_v14, %v4806_v49  ;;  %3998 = vrcp.f32 %v1727_v22  ;;  %3725 = vmatprep.subr.bf16.mxu0 %v3724_v17 }
 0x3ff   : > { %3727 = vmatpush3.bf16.msra.mxu0 %v3724_v17 }
 0x400   : > { %3423 = vmatprep.mubr.f32.mxu0 %v1771_v25  ;;  %3479 = vmatprep.mubr.f32.mxu1 %v1771_v25 }
 0x401   : > { %3424 = vmatmul.mubr.f32.gmra.mrb[42].mxu0 %v1772_v39  ;;  %3480 = vmatmul.mubr.f32.gmra.mrb[42].mxu1 %v1772_v39 }
 0x402   : > { %3729 = vmatprep.subr.bf16.mxu0 %v3728_v38 }
 0x403   : > { %v3993_v28 = vpop.eup %3992  ;;  %3731 = vmatpush3.bf16.msra.mxu0 %v3728_v38 }
 0x404   : > { %v3995_v44 = vpop.eup %3994  ;;  %3733 = vmatprep.subr.bf16.mxu0 %v3732_v40  ;;  %v1774_v49 = vmul.f32 %v3993_v28, %v4820_v21  ;;  %v4933_v21 = vld [vmem:[%s5629_s13] ss:$0 sm:$0xff] }
 0x405   : > { %v1773_v32 = vmul.f32 %v3995_v44, %v4826_v35 }
 0x407   : > { %v3997_v47 = vpop.eup %3996  ;;  %3426 = vmatprep.mubr.f32.mxu0 %v1773_v32  ;;  %3482 = vmatprep.mubr.f32.mxu1 %v1773_v32 }
 0x408   : > { %v3999_v50 = vpop.eup %3998  ;;  %3427 = vmatmul.mubr.f32.gmra.mrb[44].mxu0 %v1774_v49  ;;  %3483 = vmatmul.mubr.f32.gmra.mrb[44].mxu1 %v1774_v49  ;;  %v1776_v53 = vmul.f32 %v3997_v47, %v4844_v36 }
 0x409   : > { %v1775_v6 = vmul.f32 %v3999_v50, %v4851_v59  ;;  %3735 = vmatpush3.bf16.msra.mxu0 %v3732_v40 }
 0x40b   : > { %3429 = vmatprep.mubr.f32.mxu0 %v1775_v6  ;;  %3485 = vmatprep.mubr.f32.mxu1 %v1775_v6 }
 0x40c   : > { %3430 = vmatmul.mubr.f32.gmra.mrb[46].mxu0 %v1776_v53  ;;  %3486 = vmatmul.mubr.f32.gmra.mrb[46].mxu1 %v1776_v53 }
 0x40d   : > { %3520 = vmatprep.mubr.f32.mxu0 %v4817_v30  ;;  %v4928_v30 = vld [vmem:[%s5627_s11] ss:$0 sm:$0xff] }
 0x410   : > { %3521 = vmatmul.mubr.f32.vlgmr.msra.gmra.mrb[48].mxu0 %v4823_v18 }
 0x411   : > { %3523 = vmatprep.mubr.f32.mxu0 %v4841_v48 }
 0x414   : > { %3524 = vmatmul.mubr.f32.gmra.mrb[50].mxu0 %v4848_v56 }
 0x415   : > { %3526 = vmatprep.mubr.f32.mxu0 %v4866_v4 }
 0x418   : > { %3527 = vmatmul.mubr.f32.gmra.mrb[52].mxu0 %v4869_v10 }
 0x419   : > { %3529 = vmatprep.mubr.f32.mxu0 %v4882_v20 }
 0x41c   : > { %3530 = vmatmul.mubr.f32.gmra.mrb[54].mxu0 %v4885_v51 }
 0x41d   : > { %3532 = vmatprep.mubr.f32.mxu0 %v1769_v26 }
 0x420   : > { %3533 = vmatmul.mubr.f32.gmra.mrb[56].mxu0 %v1770_v27 }
 0x421   : > { %3535 = vmatprep.mubr.f32.mxu0 %v1771_v25 }
 0x424   : > { %3536 = vmatmul.mubr.f32.gmra.mrb[58].mxu0 %v1772_v39 }
 0x425   : > { %3538 = vmatprep.mubr.f32.mxu0 %v1773_v32 }
 0x428   : > { %3539 = vmatmul.mubr.f32.gmra.mrb[60].mxu0 %v1774_v49 }
 0x429   : > { %3541 = vmatprep.mubr.f32.mxu0 %v1775_v6 }
 0x42c   : > { %3542 = vmatmul.mubr.f32.gmra.mrb[62].mxu0 %v1776_v53 }
 0x4bd   : > { %v3410_v18 = vpop.f32.mrb[32].mxu0  ;;  %v3466_v35 = vpop.f32.mrb[32].mxu1 }
 0x4be   : > { %v1872_v48 = vadd.f32 %v3410_v18, %v4928_v30  ;;  %v4943_v36 = vadd.f32 %v3466_v35, %v4933_v21  ;;  %v1866_v54 = vpop.f32.mrb[33].mxu0  ;;  %v2034_v56 = vpop.f32.mrb[33].mxu1 }
 0x4bf   : > { %v1867_v43 = vadd.f32 %v4928_v30, %v1866_v54  ;;  %v4947_v59 = vadd.f32 %v4933_v21, %v2034_v56 }
 0x4c0   : > { %2588 = vst [vmem:[%s4939_s24 + $0x8] sm:$0xff] %v1872_v48  ;;  %v2330_v46 = vand.u32 2147483647, %v4943_v36  ;;  %v2282_v35 = vmax.f32 %v4943_v36, 0.0  ;;  %vm2298_vm1 = vcmp.ne.f32.partialorder %v4943_v36, %v4943_v36 }
 0x4c1   : > { %2587 = vst [vmem:[%s4939_s24] sm:$0xff] %v1867_v43  ;;  %v2329_v60 = vand.u32 2147483647, %v4947_v59  ;;  %v3413_v62 = vpop.f32.mrb[34].mxu0  ;;  %v3469_v37 = vpop.f32.mrb[34].mxu1  ;;  %v2281_v48 = vmax.f32 %v4947_v59, 0.0  ;;  %vm2297_vm2 = vcmp.ne.f32.partialorder %v4947_v59, %v4947_v59 }
 0x4c2   : > { %v2346_v9 = vsub.f32 0.0, %v2330_v46  ;;  %v1882_v19 = vadd.f32 %v3413_v62, %v4928_v30  ;;  %v4955_v1 = vadd.f32 %v3469_v37, %v4933_v21  ;;  %v1876_v3 = vpop.f32.mrb[35].mxu0  ;;  %v2044_v4 = vpop.f32.mrb[35].mxu1  ;;  %v5011_v46 = vstv %s4977_s25 }
 0x4c3   : > { %v2345_v8 = vsub.f32 0.0, %v2329_v60  ;;  %v1877_v10 = vadd.f32 %v4928_v30, %v1876_v3  ;;  %v4959_v11 = vadd.f32 %v4933_v21, %v2044_v4 }
 0x4c4   : > { %v2363_v41 = vmul.f32 1.442695, %v2346_v9  ;;  %2590 = vst [vmem:[%s4939_s24 + $0x18] sm:$0xff] %v1882_v19  ;;  %v2332_v5 = vand.u32 2147483647, %v4955_v1  ;;  %v2284_v3 = vmax.f32 %v4955_v1, 0.0  ;;  %vm2300_vm7 = vcmp.ne.f32.partialorder %v4955_v1, %v4955_v1 }
 0x4c5   : > { %v2361_v42 = vmul.f32 1.442695, %v2345_v8  ;;  %2589 = vst [vmem:[%s4939_s24 + $0x10] sm:$0xff] %v1877_v10  ;;  %v2331_v52 = vand.u32 2147483647, %v4959_v11  ;;  %v3416_v13 = vpop.f32.mrb[36].mxu0  ;;  %vm2299_vm8 = vcmp.ne.f32.partialorder %v4959_v11, %v4959_v11 }
 0x4c6   : > { %4000 = vpow2.f32 %v2363_v41  ;;  %v2348_v0 = vsub.f32 0.0, %v2332_v5  ;;  %v1892_v16 = vadd.f32 %v3416_v13, %v4928_v30  ;;  %v3472_v20 = vpop.f32.mrb[36].mxu1  ;;  %v1886_v63 = vpop.f32.mrb[37].mxu0  ;;  %v2283_v4 = vmax.f32 %v4959_v11, 0.0 }
 0x4c7   : > { %4002 = vpow2.f32 %v2361_v42  ;;  %v2347_v61 = vsub.f32 0.0, %v2331_v52  ;;  %v4967_v51 = vadd.f32 %v3472_v20, %v4933_v21  ;;  %v1887_v55 = vadd.f32 %v4928_v30, %v1886_v63  ;;  %v2054_v23 = vpop.f32.mrb[37].mxu1 }
 0x4c8   : > { %v2367_v24 = vmul.f32 1.442695, %v2348_v0  ;;  %2592 = vst [vmem:[%s4939_s24 + $0x28] sm:$0xff] %v1892_v16  ;;  %v4972_v2 = vadd.f32 %v4933_v21, %v2054_v23 }
 0x4c9   : > { %v2365_v7 = vmul.f32 1.442695, %v2347_v61  ;;  %v2334_v45 = vand.u32 2147483647, %v4967_v51  ;;  %2591 = vst [vmem:[%s4939_s24 + $0x20] sm:$0xff] %v1887_v55  ;;  %vm2302_vm9 = vcmp.ne.f32.partialorder %v4967_v51, %v4967_v51 }
 0x4ca   : > { %4004 = vpow2.f32 %v2367_v24  ;;  %v2333_v58 = vand.u32 2147483647, %v4972_v2  ;;  %v2286_v24 = vmax.f32 %v4967_v51, 0.0  ;;  %vm2301_vm11 = vcmp.ne.f32.partialorder %v4972_v2, %v4972_v2 }
 0x4cb   : > { %4006 = vpow2.f32 %v2365_v7  ;;  %v2350_v26 = vsub.f32 0.0, %v2334_v45  ;;  %v2285_v45 = vmax.f32 %v4972_v2, 0.0 }
 0x4cc   : > { %v2349_v17 = vsub.f32 0.0, %v2333_v58  ;;  %v3419_v29 = vpop.f32.mrb[38].mxu0  ;;  %v3475_v27 = vpop.f32.mrb[38].mxu1 }
 0x4cd   : > { %v2371_v15 = vmul.f32 1.442695, %v2350_v26  ;;  %v1902_v57 = vadd.f32 %v3419_v29, %v4928_v30  ;;  %v4981_v33 = vadd.f32 %v3475_v27, %v4933_v21  ;;  %v1896_v34 = vpop.f32.mrb[39].mxu0  ;;  %v2064_v22 = vpop.f32.mrb[39].mxu1 }
 0x4ce   : > { %v2369_v14 = vmul.f32 1.442695, %v2349_v17  ;;  %v1897_v12 = vadd.f32 %v4928_v30, %v1896_v34  ;;  %v4985_v31 = vadd.f32 %v4933_v21, %v2064_v22 }
 0x4cf   : > { %4008 = vpow2.f32 %v2371_v15  ;;  %2594 = vst [vmem:[%s4939_s24 + $0x38] sm:$0xff] %v1902_v57  ;;  %v2336_v25 = vand.u32 2147483647, %v4981_v33  ;;  %v2288_v17 = vmax.f32 %v4981_v33, 0.0 }
 0x4d0   : > { %v4989_v38 = vpop.eup %4000  ;;  %4010 = vpow2.f32 %v2369_v14  ;;  %2593 = vst [vmem:[%s4939_s24 + $0x30] sm:$0xff] %v1897_v12  ;;  %v2335_v39 = vand.u32 2147483647, %v4985_v31  ;;  %v3422_v40 = vpop.f32.mrb[40].mxu0 }
 0x4d1   : > { %v4993_v28 = vpop.f32.mrb[40].mxu1  ;;  %v4995_v44 = vpop.eup %4002  ;;  %v2402_v32 = vadd.f32 1.0, %v4989_v38  ;;  %v2352_v49 = vsub.f32 0.0, %v2336_v25  ;;  %v2405_v43 = vmul.f32 -0.5, %v4989_v38  ;;  %v2408_v19 = vand.u32 2147483647, %v4989_v38 }
 0x4d2   : > { %v1906_v47 = vpop.f32.mrb[41].mxu0  ;;  %v2393_v50 = vadd.f32 1.0, %v4995_v44  ;;  %v4999_v6 = vpop.f32.mrb[41].mxu1  ;;  %v2351_v53 = vsub.f32 0.0, %v2335_v39  ;;  %v2396_v41 = vmul.f32 -0.5, %v4995_v44  ;;  %v1912_v42 = vadd.f32 %v3422_v40, %v4928_v30 }
 0x4d3   : > { %4012 = vlog2.f32 %v2402_v32  ;;  %v2375_v62 = vmul.f32 1.442695, %v2352_v49  ;;  %v2399_v52 = vand.u32 2147483647, %v4995_v44  ;;  %v2406_v20 = vadd.f32 1.0, %v2405_v43 }
 0x4d4   : > { %v5001_v18 = vpop.eup %4004  ;;  %4014 = vlog2.f32 %v2393_v50  ;;  %v5005_v54 = vpop.f32.mrb[42].mxu0  ;;  %v2373_v5 = vmul.f32 1.442695, %v2351_v53  ;;  %2596 = vst [vmem:[%s4939_s24 + $0x48] sm:$0xff] %v1912_v42  ;;  %v1907_v61 = vadd.f32 %v4928_v30, %v1906_v47  ;;  %v2397_v58 = vadd.f32 1.0, %v2396_v41 }
 0x4d5   : > { %v5007_v56 = vpop.eup %4006  ;;  %v2420_v60 = vadd.f32 1.0, %v5001_v18  ;;  %v5014_v37 = vpop.f32.mrb[42].mxu1  ;;  %v2423_v13 = vmul.f32 -0.5, %v5001_v18  ;;  %v2426_v63 = vand.u32 2147483647, %v5001_v18  ;;  %v2407_v25 = vmul.f32 %v4989_v38, %v2406_v20 }
 0x4d6   : > { %v5016_v9 = vpop.f32.mrb[43].mxu0  ;;  %v2411_v8 = vadd.f32 1.0, %v5007_v56  ;;  %v5022_v10 = vpop.f32.mrb[43].mxu1  ;;  %v2414_v0 = vmul.f32 -0.5, %v5007_v56  ;;  %v2417_v23 = vand.u32 2147483647, %v5007_v56  ;;  %v5075_v38 = vadd.f32 %v4993_v28, %v4933_v21 }
 0x4d7   : > { %4016 = vlog2.f32 %v2420_v60  ;;  %2595 = vst [vmem:[%s4939_s24 + $0x40] sm:$0xff] %v1907_v61  ;;  %vm5051_vm3 = vcmp.lt.f32.partialorder %v2408_v19, 0.0004427343  ;;  %v2424_v57 = vadd.f32 1.0, %v2423_v13  ;;  %vm5060_vm4 = vcmp.lt.f32.partialorder %v2399_v52, 0.0004427343 }
 0x4d8   : > { %4018 = vlog2.f32 %v2411_v8  ;;  %v2415_v34 = vadd.f32 1.0, %v2414_v0  ;;  %vm5064_vm5 = vcmp.lt.f32.partialorder %v2426_v63, 0.0004427343  ;;  %vm5068_vm6 = vcmp.lt.f32.partialorder %v2417_v23, 0.0004427343 }
 0x4d9   : > { %v5029_v16 = vpop.eup %4008  ;;  %4020 = vpow2.f32 %v2375_v62  ;;  %v2398_v43 = vmul.f32 %v4995_v44, %v2397_v58  ;;  %v5083_v62 = vadd.f32 %v4933_v21, %v4999_v6  ;;  %v2425_v41 = vmul.f32 %v5001_v18, %v2424_v57 }
 0x4da   : > { %v5034_v55 = vpop.eup %4010  ;;  %v2438_v7 = vadd.f32 1.0, %v5029_v16  ;;  %4022 = vpow2.f32 %v2373_v5  ;;  %v2441_v50 = vmul.f32 -0.5, %v5029_v16  ;;  %v2416_v44 = vmul.f32 %v5007_v56, %v2415_v34 }
 0x4db   : > { %v2429_v26 = vadd.f32 1.0, %v5034_v55  ;;  %v5047_v29 = vpop.f32.mrb[44].mxu0  ;;  %v5049_v27 = vpop.f32.mrb[44].mxu1  ;;  %v2432_v60 = vmul.f32 -0.5, %v5034_v55  ;;  %v1922_v5 = vadd.f32 %v5005_v54, %v4928_v30  ;;  %v2444_v18 = vand.u32 2147483647, %v5029_v16 }
 0x4dc   : > { %4024 = vlog2.f32 %v2438_v7  ;;  %v5055_v22 = vpop.f32.mrb[45].mxu0  ;;  %v5057_v14 = vpop.f32.mrb[45].mxu1  ;;  %v1917_v54 = vadd.f32 %v4928_v30, %v5016_v9  ;;  %v2442_v61 = vadd.f32 1.0, %v2441_v50  ;;  %v2337_v9 = vand.u32 2147483647, %v5083_v62 }
 0x4dd   : > { %v4013_v12 = vpop.eup %4012  ;;  %4026 = vlog2.f32 %v2429_v26  ;;  %2598 = vst [vmem:[%s4939_s24 + $0x58] sm:$0xff] %v1922_v5  ;;  %v2433_v26 = vadd.f32 1.0, %v2432_v60  ;;  %vm5148_vm10 = vcmp.lt.f32.partialorder %v2444_v18, 0.0004427343 }
 0x4de   : > { %v4015_v32 = vpop.eup %4014  ;;  %v2404_v49 = vmul.f32 0.6931472, %v4013_v12  ;;  %2597 = vst [vmem:[%s4939_s24 + $0x50] sm:$0xff] %v1917_v54  ;;  %v2443_v40 = vmul.f32 %v5029_v16, %v2442_v61 }
 0x4df   : > { %v2395_v53 = vmul.f32 0.6931472, %v4015_v32  ;;  %v5085_v19 = vpop.f32.mrb[46].mxu0  ;;  %v5087_v8 = vpop.f32.mrb[46].mxu1 }
 0x4e0   : > { %v2410_v28 = vsel %vm5051_vm3, %v2407_v25, %v2404_v49  ;;  %v5095_v42 = vpop.f32.mrb[47].mxu0  ;;  %v5097_v52 = vpop.f32.mrb[47].mxu1  ;;  %vm2304_vm3 = vcmp.ne.f32.partialorder %v4981_v33, %v4981_v33 }
 0x4e1   : > { %v4017_v6 = vpop.eup %4016  ;;  %v2538_v13 = vadd.f32 %v2410_v28, %v2282_v35  ;;  %v2401_v0 = vsel %vm5060_vm4, %v2398_v43, %v2395_v53  ;;  %v2338_v35 = vand.u32 2147483647, %v5075_v38  ;;  %v2434_v43 = vmul.f32 %v5034_v55, %v2433_v26 }
 0x4e2   : > { %v4019_v56 = vpop.eup %4018  ;;  %v2537_v20 = vadd.f32 %v2401_v0, %v2281_v48  ;;  %v2422_v63 = vmul.f32 0.6931472, %v4017_v6  ;;  %v2353_v28 = vsub.f32 0.0, %v2337_v9 }
 0x4e3   : > { %v5112_v23 = vpop.eup %4020  ;;  %v2554_v7 = vsel %vm2298_vm1, %v4943_v36, %v2538_v13  ;;  %v2413_v58 = vmul.f32 0.6931472, %v4019_v56  ;;  %v5120_v15 = vpop.f32.mrb[48].mxu0  ;;  %v2435_v36 = vand.u32 2147483647, %v5034_v55  ;;  %v2354_v60 = vsub.f32 0.0, %v2338_v35 }
 0x4e4   : > { %v5123_v48 = vadd.f32 %v5011_v46, %v2554_v7  ;;  %v2553_v57 = vsel %vm2297_vm2, %v4947_v59, %v2537_v20  ;;  %v2428_v34 = vsel %vm5064_vm5, %v2425_v41, %v2422_v63  ;;  %v5132_v12 = vpop.f32.mrb[49].mxu0  ;;  %v5134_v25 = vpop.eup %4022  ;;  %v2456_v59 = vadd.f32 1.0, %v5112_v23 }
 0x4e5   : > { %v5137_v39 = vadd.f32 %v5011_v46, %v2553_v57  ;;  %v2540_v32 = vadd.f32 %v2428_v34, %v2284_v3  ;;  %v2419_v49 = vsel %vm5068_vm6, %v2416_v44, %v2413_v58  ;;  %v2287_v3 = vmax.f32 %v4985_v31, 0.0 }
 0x4e6   : > { %v4025_v50 = vpop.eup %4024  ;;  %4028 = vrsqrt.f32 %v5123_v48  ;;  %v2539_v44 = vadd.f32 %v2419_v49, %v2283_v4  ;;  %vm2436_vm12 = vcmp.lt.f32.partialorder %v2435_v36, 0.0004427343  ;;  %v2459_v55 = vmul.f32 -0.5, %v5112_v23 }
 0x4e7   : > { %v4027_v47 = vpop.eup %4026  ;;  %4030 = vrsqrt.f32 %v5137_v39  ;;  %v5157_v41 = vpop.f32.mrb[50].mxu0  ;;  %v2556_v16 = vsel %vm2300_vm7, %v4955_v1, %v2540_v32  ;;  %v2440_v5 = vmul.f32 0.6931472, %v4025_v50  ;;  %v2447_v54 = vadd.f32 1.0, %v5134_v25 }
 0x4e8   : > { %v2431_v6 = vmul.f32 0.6931472, %v4027_v47  ;;  %v5165_v13 = vpop.f32.mrb[51].mxu0  ;;  %v5168_v0 = vadd.f32 %v5011_v46, %v2556_v16  ;;  %4032 = vlog2.f32 %v2456_v59  ;;  %v2555_v18 = vsel %vm2299_vm8, %v4959_v11, %v2539_v44 }
 0x4e9   : > { %v2446_v1 = vsel %vm5148_vm10, %v2443_v40, %v2440_v5  ;;  %v2379_v56 = vmul.f32 1.442695, %v2354_v60  ;;  %v2377_v20 = vmul.f32 1.442695, %v2353_v28  ;;  %v5181_v63 = vadd.f32 %v5014_v37, %v4933_v21 }
 0x4ea   : > { %v2437_v4 = vsel %vm2436_vm12, %v2434_v43, %v2431_v6  ;;  %4034 = vrsqrt.f32 %v5168_v0  ;;  %vm2612_vm13 = vcmp.eq.f32.partialorder %v5123_v48, inf  ;;  %v5187_v11 = vadd.f32 %v5011_v46, %v2555_v18 }
 0x4eb   : > { %v5183_v61 = vpop.f32.mrb[52].mxu0  ;;  %v2542_v35 = vadd.f32 %v2446_v1, %v2286_v24  ;;  %v2541_v7 = vadd.f32 %v2437_v4, %v2285_v45  ;;  %vm2614_vm14 = vcmp.eq.f32.partialorder %v5123_v48, 0.0  ;;  %v2615_v37 = vand.u32 2147483648, %v5123_v48 }
 0x4ec   : > { %v5193_v58 = vpop.f32.mrb[53].mxu0  ;;  %vm2605_vm15 = vcmp.eq.f32.partialorder %v5137_v39, inf  ;;  %4036 = vlog2.f32 %v2447_v54  ;;  %vm2607_vm0 = vcmp.eq.f32.partialorder %v5137_v39, 0.0  ;;  %v2608_v26 = vand.u32 2147483648, %v5137_v39 }
 0x4ed   : > { %4038 = vrsqrt.f32 %v5187_v11  ;;  %v2460_v9 = vadd.f32 1.0, %v2459_v55  ;;  %vm2626_vm1 = vcmp.eq.f32.partialorder %v5168_v0, inf  ;;  %v2558_v24 = vsel %vm2302_vm9, %v4967_v51, %v2542_v35 }
 0x4ee   : > { %v2557_v45 = vsel %vm2301_vm11, %v4972_v2, %v2541_v7  ;;  %v2462_v57 = vand.u32 2147483647, %v5112_v23  ;;  %v5214_v32 = vadd.f32 %v5011_v46, %v2558_v24  ;;  %v2450_v59 = vmul.f32 -0.5, %v5134_v25 }
 0x4ef   : > { %v5211_v34 = vpop.f32.mrb[54].mxu0  ;;  %v5217_v49 = vadd.f32 %v5011_v46, %v2557_v45  ;;  %4040 = vpow2.f32 %v2379_v56  ;;  %vm2628_vm2 = vcmp.eq.f32.partialorder %v5168_v0, 0.0  ;;  %v2340_v2 = vand.u32 2147483647, %v5181_v63 }
 0x4f0   : > { %v4029_v36 = vpop.eup %4028  ;;  %v5220_v51 = vpop.f32.mrb[55].mxu0  ;;  %4042 = vpow2.f32 %v2377_v20  ;;  %v2629_v47 = vand.u32 2147483648, %v5168_v0  ;;  %v5238_v43 = vadd.f32 %v4933_v21, %v5022_v10  ;;  %v2461_v16 = vmul.f32 %v5112_v23, %v2460_v9 }
 0x4f1   : > { %v4031_v50 = vpop.eup %4030  ;;  %v2611_v40 = vmul.f32 %v4029_v36, %v5123_v48  ;;  %4044 = vrsqrt.f32 %v5214_v32  ;;  %vm5245_vm4 = vcmp.lt.f32.partialorder %v2462_v57, 0.0004427343  ;;  %v2451_v55 = vadd.f32 1.0, %v2450_v59 }
 0x4f2   : > { %v2604_v53 = vmul.f32 %v4031_v50, %v5137_v39  ;;  %v4033_v60 = vpop.eup %4032  ;;  %4046 = vrsqrt.f32 %v5217_v49  ;;  %v2453_v18 = vand.u32 2147483647, %v5134_v25  ;;  %vm2619_vm5 = vcmp.eq.f32.partialorder %v5187_v11, inf }
 0x4f3   : > { %v2613_v28 = vsel %vm2612_vm13, %v5123_v48, %v2611_v40  ;;  %v5249_v5 = vpop.f32.mrb[56].mxu0  ;;  %v2458_v54 = vmul.f32 0.6931472, %v4033_v60  ;;  %vm2303_vm6 = vcmp.ne.f32.partialorder %v4985_v31, %v4985_v31  ;;  %v2356_v48 = vsub.f32 0.0, %v2340_v2 }
 0x4f4   : > { %v2616_v10 = vsel %vm2614_vm14, %v2615_v37, %v2613_v28  ;;  %v2606_v6 = vsel %vm2605_vm15, %v5137_v39, %v2604_v53  ;;  %v5257_v1 = vpop.f32.mrb[57].mxu0  ;;  %v4035_v4 = vpop.eup %4034  ;;  %vm2621_vm7 = vcmp.eq.f32.partialorder %v5187_v11, 0.0  ;;  %v2339_v20 = vand.u32 2147483647, %v5238_v43 }
 0x4f5   : > { %2716 = vst [vmem:[%s5231_s28 + $0x8] sm:$0xff] %v2616_v10  ;;  %v2609_v23 = vsel %vm2607_vm0, %v2608_v26, %v2606_v6  ;;  %v2625_v56 = vmul.f32 %v4035_v4, %v5168_v0  ;;  %v1932_v35 = vadd.f32 %v5047_v29, %v4928_v30  ;;  %v2622_v7 = vand.u32 2147483648, %v5187_v11 }
 0x4f6   : > { %2715 = vst [vmem:[%s5231_s28] sm:$0xff] %v2609_v23  ;;  %v4037_v39 = vpop.eup %4036  ;;  %v2464_v37 = vsel %vm5245_vm4, %v2461_v16, %v2458_v54  ;;  %v2383_v26 = vmul.f32 1.442695, %v2356_v48  ;;  %v1927_v9 = vadd.f32 %v4928_v30, %v5055_v22  ;;  %v2452_v59 = vmul.f32 %v5134_v25, %v2451_v55 }
 0x4f7   : > { %v5276_v24 = vpop.f32.mrb[58].mxu0  ;;  %v4039_v45 = vpop.eup %4038  ;;  %v2627_v57 = vsel %vm2626_vm1, %v5168_v0, %v2625_v56  ;;  %v2544_v29 = vadd.f32 %v2464_v37, %v2288_v17  ;;  %v2449_v36 = vmul.f32 0.6931472, %v4037_v39  ;;  %2600 = vst [vmem:[%s4939_s24 + $0x68] sm:$0xff] %v1932_v35  ;;  %vm2454_vm8 = vcmp.lt.f32.partialorder %v2453_v18, 0.0004427343 }
 0x4f8   : > { %v5285_v50 = vpop.f32.mrb[59].mxu0  ;;  %v2630_v40 = vsel %vm2628_vm2, %v2629_v47, %v2627_v57  ;;  %v2618_v22 = vmul.f32 %v4039_v45, %v5187_v11  ;;  %4048 = vpow2.f32 %v2383_v26  ;;  %2599 = vst [vmem:[%s4939_s24 + $0x60] sm:$0xff] %v1927_v9  ;;  %vm2640_vm9 = vcmp.eq.f32.partialorder %v5214_v32, inf }
 0x4f9   : > { %v5291_v2 = vpop.eup %4040  ;;  %2718 = vst [vmem:[%s5231_s28 + $0x18] sm:$0xff] %v2630_v40  ;;  %v2560_v17 = vsel %vm2304_vm3, %v4981_v33, %v2544_v29  ;;  %v2455_v25 = vsel %vm2454_vm8, %v2452_v59, %v2449_v36  ;;  %v2355_v53 = vsub.f32 0.0, %v2339_v20  ;;  %vm2642_vm10 = vcmp.eq.f32.partialorder %v5214_v32, 0.0 }
 0x4fa   : > { %v5299_v0 = vpop.eup %4042  ;;  %v2620_v47 = vsel %vm2619_vm5, %v5187_v11, %v2618_v22  ;;  %v5305_v60 = vadd.f32 %v5011_v46, %v2560_v17  ;;  %v2543_v28 = vadd.f32 %v2455_v25, %v2287_v3  ;;  %v2474_v16 = vadd.f32 1.0, %v5291_v2 }
 0x4fb   : > { %v5310_v44 = vpop.f32.mrb[60].mxu0  ;;  %v4045_v33 = vpop.eup %4044  ;;  %v2623_v10 = vsel %vm2621_vm7, %v2622_v7, %v2620_v47  ;;  %v2643_v6 = vand.u32 2147483648, %v5214_v32  ;;  %v2465_v55 = vadd.f32 1.0, %v5299_v0  ;;  %vm2633_vm11 = vcmp.eq.f32.partialorder %v5217_v49, inf }
 0x4fc   : > { %v5317_v18 = vpop.f32.mrb[61].mxu0  ;;  %v4047_v4 = vpop.eup %4046  ;;  %2717 = vst [vmem:[%s5231_s28 + $0x10] sm:$0xff] %v2623_v10  ;;  %v2639_v3 = vmul.f32 %v4045_v33, %v5214_v32  ;;  %vm2635_vm12 = vcmp.eq.f32.partialorder %v5217_v49, 0.0  ;;  %4050 = vrsqrt.f32 %v5305_v60  ;;  %v2636_v23 = vand.u32 2147483648, %v5217_v49 }
 0x4fd   : > { %v2632_v11 = vmul.f32 %v4047_v4, %v5217_v49  ;;  %v2559_v54 = vsel %vm2303_vm6, %v4985_v31, %v2543_v28  ;;  %4052 = vlog2.f32 %v2474_v16  ;;  %v2381_v20 = vmul.f32 1.442695, %v2355_v53 }
 0x4fe   : > { %v2641_v48 = vsel %vm2640_vm9, %v5214_v32, %v2639_v3  ;;  %v5334_v56 = vadd.f32 %v5011_v46, %v2559_v54  ;;  %v5338_v35 = vadd.f32 %v5049_v27, %v4933_v21  ;;  %v2477_v37 = vmul.f32 -0.5, %v5291_v2 }
 0x4ff   : > { %v5340_v39 = vpop.f32.mrb[62].mxu0  ;;  %v2644_v7 = vsel %vm2642_vm10, %v2643_v6, %v2641_v48  ;;  %v2634_v31 = vsel %vm2633_vm11, %v5217_v49, %v2632_v11  ;;  %4054 = vlog2.f32 %v2465_v55  ;;  %v2480_v27 = vand.u32 2147483647, %v5291_v2 }
 0x500   : > { %v5346_v26 = vpop.f32.mrb[63].mxu0  ;;  %2720 = vst [vmem:[%s5231_s28 + $0x28] sm:$0xff] %v2644_v7  ;;  %v2637_v9 = vsel %vm2635_vm12, %v2636_v23, %v2634_v31  ;;  %4056 = vrsqrt.f32 %v5334_v56  ;;  %v2468_v45 = vmul.f32 -0.5, %v5299_v0  ;;  %vm2654_vm13 = vcmp.eq.f32.partialorder %v5305_v60, inf }
 0x501   : > { %2719 = vst [vmem:[%s5231_s28 + $0x20] sm:$0xff] %v2637_v9  ;;  %v2290_v32 = vmax.f32 %v5075_v38, 0.0  ;;  %v2289_v57 = vmax.f32 %v5083_v62, 0.0  ;;  %4058 = vpow2.f32 %v2381_v20  ;;  %v2342_v49 = vand.u32 2147483647, %v5338_v35 }
 0x502   : > { %v5358_v29 = vpop.eup %4048  ;;  %v5363_v36 = vadd.f32 %v4933_v21, %v5057_v14  ;;  %v1942_v59 = vadd.f32 %v5085_v19, %v4928_v30  ;;  %vm2656_vm14 = vcmp.eq.f32.partialorder %v5305_v60, 0.0  ;;  %v2657_v40 = vand.u32 2147483648, %v5305_v60 }
 0x503   : > { %v2478_v22 = vadd.f32 1.0, %v2477_v37  ;;  %v2492_v17 = vadd.f32 1.0, %v5358_v29  ;;  %vm2647_vm15 = vcmp.eq.f32.partialorder %v5334_v56, inf  ;;  %vm2306_vm0 = vcmp.ne.f32.partialorder %v5075_v38, %v5075_v38 }
 0x504   : > { %vm5373_vm1 = vcmp.lt.f32.partialorder %v2480_v27, 0.0004427343  ;;  %v2469_v14 = vadd.f32 1.0, %v2468_v45  ;;  %v2358_v53 = vsub.f32 0.0, %v2342_v49  ;;  %2602 = vst [vmem:[%s4939_s24 + $0x78] sm:$0xff] %v1942_v59  ;;  %v5382_v28 = vadd.f32 %v5087_v8, %v4933_v21 }
 0x505   : > { %v2471_v19 = vand.u32 2147483647, %v5299_v0  ;;  %4060 = vlog2.f32 %v2492_v17  ;;  %v2341_v47 = vand.u32 2147483647, %v5363_v36  ;;  %vm2649_vm2 = vcmp.eq.f32.partialorder %v5334_v56, 0.0 }
 0x506   : > { %v4051_v16 = vpop.eup %4050  ;;  %v2650_v33 = vand.u32 2147483648, %v5334_v56  ;;  %vm2305_vm3 = vcmp.ne.f32.partialorder %v5083_v62, %v5083_v62  ;;  %v2387_v10 = vmul.f32 1.442695, %v2358_v53  ;;  %v1937_v6 = vadd.f32 %v4928_v30, %v5095_v42 }
 0x507   : > { %v4053_v55 = vpop.eup %4052  ;;  %v2653_v4 = vmul.f32 %v4051_v16, %v5305_v60  ;;  %v2479_v3 = vmul.f32 %v5291_v2, %v2478_v22  ;;  %v2357_v8 = vsub.f32 0.0, %v2341_v47  ;;  %v5394_v11 = vadd.f32 %v4933_v21, %v5097_v52  ;;  %v5410_v52 = vld [vmem:[%s5631_s15] ss:$0 sm:$0xff] }
 0x508   : > { %v2476_v23 = vmul.f32 0.6931472, %v4053_v55  ;;  %v2495_v54 = vmul.f32 -0.5, %v5358_v29  ;;  %4062 = vpow2.f32 %v2387_v10  ;;  %v2344_v48 = vand.u32 2147483647, %v5382_v28  ;;  %2601 = vst [vmem:[%s4939_s24 + $0x70] sm:$0xff] %v1937_v6 }
 0x509   : > { %v4055_v20 = vpop.eup %4054  ;;  %v2655_v30 = vsel %vm2654_vm13, %v5305_v60, %v2653_v4  ;;  %v2470_v42 = vmul.f32 %v5299_v0, %v2469_v14  ;;  %vm5403_vm4 = vcmp.lt.f32.partialorder %v2471_v19, 0.0004427343  ;;  %v2385_v21 = vmul.f32 1.442695, %v2357_v8 }
 0x50a   : > { %v4057_v7 = vpop.eup %4056  ;;  %v2658_v31 = vsel %vm2656_vm14, %v2657_v40, %v2655_v30  ;;  %v2482_v37 = vsel %vm5373_vm1, %v2479_v3, %v2476_v23  ;;  %v2467_v9 = vmul.f32 0.6931472, %v4055_v20  ;;  %v2360_v27 = vsub.f32 0.0, %v2344_v48 }
 0x50b   : > { %2722 = vst [vmem:[%s5231_s28 + $0x38] sm:$0xff] %v2658_v31  ;;  %v2646_v0 = vmul.f32 %v4057_v7, %v5334_v56  ;;  %v2546_v45 = vadd.f32 %v2482_v37, %v2290_v32  ;;  %4064 = vpow2.f32 %v2385_v21  ;;  %v2343_v49 = vand.u32 2147483647, %v5394_v11  ;;  %v5425_v60 = vpop.eup %4058 }
 0x50c   : > { %v2473_v59 = vsel %vm5403_vm4, %v2470_v42, %v2467_v9  ;;  %v2496_v40 = vadd.f32 1.0, %v2495_v54  ;;  %v2208_v32 = vadd.f32 %v5120_v15, %v5410_v52  ;;  %v2203_v22 = vadd.f32 %v5410_v52, %v5132_v12 }
 0x50d   : > { %v2648_v17 = vsel %vm2647_vm15, %v5334_v56, %v2646_v0  ;;  %v2562_v25 = vsel %vm2306_vm0, %v5075_v38, %v2546_v45  ;;  %v2545_v14 = vadd.f32 %v2473_v59, %v2289_v57  ;;  %v2483_v53 = vadd.f32 1.0, %v5425_v60 }
 0x50e   : > { %v2651_v19 = vsel %vm2649_vm2, %v2650_v33, %v2648_v17  ;;  %v5444_v15 = vadd.f32 %v5011_v46, %v2562_v25  ;;  %v2498_v12 = vand.u32 2147483647, %v5358_v29  ;;  %v2391_v47 = vmul.f32 1.442695, %v2360_v27  ;;  %2732 = vst [vmem:[%s5423_s20 + $0x8] sm:$0xff] %v2208_v32  ;;  %2731 = vst [vmem:[%s5423_s20] sm:$0xff] %v2203_v22 }
 0x50f   : > { %v4061_v16 = vpop.eup %4060  ;;  %2721 = vst [vmem:[%s5231_s28 + $0x30] sm:$0xff] %v2651_v19  ;;  %v2561_v38 = vsel %vm2305_vm3, %v5083_v62, %v2545_v14  ;;  %4066 = vlog2.f32 %v2483_v53  ;;  %v2359_v57 = vsub.f32 0.0, %v2343_v49  ;;  %v2218_v56 = vadd.f32 %v5157_v41, %v5410_v52 }
 0x510   : > { %4068 = vrsqrt.f32 %v5444_v15  ;;  %v5458_v33 = vadd.f32 %v5011_v46, %v2561_v38  ;;  %v2494_v10 = vmul.f32 0.6931472, %v4061_v16  ;;  %v2497_v6 = vmul.f32 %v5358_v29, %v2496_v40 }
 0x511   : > { %v2486_v55 = vmul.f32 -0.5, %v5425_v60  ;;  %2734 = vst [vmem:[%s5423_s20 + $0x18] sm:$0xff] %v2218_v56  ;;  %4070 = vpow2.f32 %v2391_v47  ;;  %v2389_v62 = vmul.f32 1.442695, %v2359_v57  ;;  %v2213_v41 = vadd.f32 %v5410_v52, %v5165_v13 }
 0x512   : > { %v5463_v4 = vpop.eup %4062  ;;  %v2228_v3 = vadd.f32 %v5183_v61, %v5410_v52  ;;  %4072 = vrsqrt.f32 %v5458_v33  ;;  %v2292_v8 = vmax.f32 %v5181_v63, 0.0  ;;  %vm2499_vm5 = vcmp.lt.f32.partialorder %v2498_v12, 0.0004427343 }
 0x513   : > { %vm2308_vm6 = vcmp.ne.f32.partialorder %v5181_v63, %v5181_v63  ;;  %v2500_v29 = vsel %vm2499_vm5, %v2497_v6, %v2494_v10  ;;  %v2510_v23 = vadd.f32 1.0, %v5463_v4  ;;  %2733 = vst [vmem:[%s5423_s20 + $0x10] sm:$0xff] %v2213_v41  ;;  %v2489_v48 = vand.u32 2147483647, %v5425_v60 }
 0x514   : > { %2736 = vst [vmem:[%s5423_s20 + $0x28] sm:$0xff] %v2228_v3  ;;  %v2548_v13 = vadd.f32 %v2500_v29, %v2292_v8  ;;  %4074 = vpow2.f32 %v2389_v62  ;;  %v2223_v61 = vadd.f32 %v5410_v52, %v5193_v58  ;;  %v2291_v20 = vmax.f32 %v5238_v43, 0.0 }
 0x515   : > { %v5476_v54 = vpop.eup %4064  ;;  %v2487_v30 = vadd.f32 1.0, %v2486_v55  ;;  %4076 = vlog2.f32 %v2510_v23  ;;  %vm2668_vm7 = vcmp.eq.f32.partialorder %v5444_v15, inf  ;;  %vm2307_vm8 = vcmp.ne.f32.partialorder %v5238_v43, %v5238_v43 }
 0x516   : > { %v2501_v42 = vadd.f32 1.0, %v5476_v54  ;;  %v2564_v2 = vsel %vm2308_vm6, %v5181_v63, %v2548_v13  ;;  %2735 = vst [vmem:[%s5423_s20 + $0x20] sm:$0xff] %v2223_v61  ;;  %v2238_v21 = vadd.f32 %v5211_v34, %v5410_v52  ;;  %vm2670_vm9 = vcmp.eq.f32.partialorder %v5444_v15, 0.0 }
 0x517   : > { %v2671_v58 = vand.u32 2147483648, %v5444_v15  ;;  %v5493_v7 = vadd.f32 %v5011_v46, %v2564_v2  ;;  %vm5495_vm10 = vcmp.lt.f32.partialorder %v2489_v48, 0.0004427343  ;;  %v2233_v34 = vadd.f32 %v5410_v52, %v5220_v51 }
 0x518   : > { %4078 = vlog2.f32 %v2501_v42  ;;  %2738 = vst [vmem:[%s5423_s20 + $0x38] sm:$0xff] %v2238_v21  ;;  %v2248_v37 = vadd.f32 %v5249_v5, %v5410_v52  ;;  %v2243_v9 = vadd.f32 %v5410_v52, %v5257_v1  ;;  %vm2661_vm11 = vcmp.eq.f32.partialorder %v5458_v33, inf }
 0x519   : > { %v4067_v31 = vpop.eup %4066  ;;  %4080 = vrsqrt.f32 %v5493_v7  ;;  %v2488_v0 = vmul.f32 %v5425_v60, %v2487_v30  ;;  %v2513_v45 = vmul.f32 -0.5, %v5463_v4  ;;  %v2504_v51 = vmul.f32 -0.5, %v5476_v54  ;;  %2737 = vst [vmem:[%s5423_s20 + $0x30] sm:$0xff] %v2233_v34 }
 0x51a   : > { %v4069_v27 = vpop.eup %4068  ;;  %v2485_v59 = vmul.f32 0.6931472, %v4067_v31  ;;  %2740 = vst [vmem:[%s5423_s20 + $0x48] sm:$0xff] %v2248_v37  ;;  %2739 = vst [vmem:[%s5423_s20 + $0x40] sm:$0xff] %v2243_v9  ;;  %v2258_v5 = vadd.f32 %v5276_v24, %v5410_v52  ;;  %v2253_v60 = vadd.f32 %v5410_v52, %v5285_v50  ;;  %v2268_v40 = vadd.f32 %v5310_v44, %v5410_v52 }
 0x51b   : > { %v2667_v49 = vmul.f32 %v4069_v27, %v5444_v15  ;;  %v5517_v1 = vpop.eup %4070  ;;  %v2263_v32 = vadd.f32 %v5410_v52, %v5317_v18  ;;  %v2278_v22 = vadd.f32 %v5340_v39, %v5410_v52  ;;  %vm2663_vm12 = vcmp.eq.f32.partialorder %v5458_v33, 0.0 }
 0x51c   : > { %v4073_v24 = vpop.eup %4072  ;;  %v2491_v50 = vsel %vm5495_vm10, %v2488_v0, %v2485_v59  ;;  %v2528_v44 = vadd.f32 1.0, %v5517_v1  ;;  %2742 = vst [vmem:[%s5423_s20 + $0x58] sm:$0xff] %v2258_v5  ;;  %v2514_v14 = vadd.f32 1.0, %v2513_v45  ;;  %2741 = vst [vmem:[%s5423_s20 + $0x50] sm:$0xff] %v2253_v60  ;;  %v2664_v19 = vand.u32 2147483648, %v5458_v33 }
 0x51d   : > { %v2669_v17 = vsel %vm2668_vm7, %v5444_v15, %v2667_v49  ;;  %v2660_v25 = vmul.f32 %v4073_v24, %v5458_v33  ;;  %v2547_v39 = vadd.f32 %v2491_v50, %v2291_v20  ;;  %2744 = vst [vmem:[%s5423_s20 + $0x68] sm:$0xff] %v2268_v40  ;;  %2743 = vst [vmem:[%s5423_s20 + $0x60] sm:$0xff] %v2263_v32  ;;  %v2516_v12 = vand.u32 2147483647, %v5463_v4 }
 0x51e   : > { %v2672_v18 = vsel %vm2670_vm9, %v2671_v58, %v2669_v17  ;;  %2746 = vst [vmem:[%s5423_s20 + $0x78] sm:$0xff] %v2278_v22  ;;  %v5542_v53 = vpop.eup %4074  ;;  %4082 = vlog2.f32 %v2528_v44  ;;  %v2273_v15 = vadd.f32 %v5410_v52, %v5346_v26  ;;  %v2505_v57 = vadd.f32 1.0, %v2504_v51 }
 0x51f   : > { %2724 = vst [vmem:[%s5231_s28 + $0x48] sm:$0xff] %v2672_v18  ;;  %v4077_v47 = vpop.eup %4076  ;;  %v2662_v16 = vsel %vm2661_vm11, %v5458_v33, %v2660_v25  ;;  %v2563_v38 = vsel %vm2307_vm8, %v5238_v43, %v2547_v39  ;;  %v2519_v56 = vadd.f32 1.0, %v5542_v53  ;;  %v2507_v52 = vand.u32 2147483647, %v5476_v54 }
 0x520   : > { %v2665_v10 = vsel %vm2663_vm12, %v2664_v19, %v2662_v16  ;;  %v5560_v6 = vadd.f32 %v5011_v46, %v2563_v38  ;;  %v2512_v26 = vmul.f32 0.6931472, %v4077_v47  ;;  %2745 = vst [vmem:[%s5423_s20 + $0x70] sm:$0xff] %v2273_v15  ;;  %v2515_v62 = vmul.f32 %v5463_v4, %v2514_v14 }
 0x521   : > { %2723 = vst [vmem:[%s5231_s28 + $0x40] sm:$0xff] %v2665_v10  ;;  %4084 = vlog2.f32 %v2519_v56  ;;  %v2294_v43 = vmax.f32 %v5338_v35, 0.0  ;;  %vm2310_vm13 = vcmp.ne.f32.partialorder %v5338_v35, %v5338_v35  ;;  %vm2517_vm14 = vcmp.lt.f32.partialorder %v2516_v12, 0.0004427343 }
 0x522   : > { %v4079_v55 = vpop.eup %4078  ;;  %4086 = vrsqrt.f32 %v5560_v6  ;;  %v2518_v41 = vsel %vm2517_vm14, %v2515_v62, %v2512_v26  ;;  %v2506_v8 = vmul.f32 %v5476_v54, %v2505_v57  ;;  %v2531_v29 = vmul.f32 -0.5, %v5517_v1 }
 0x523   : > { %v4081_v33 = vpop.eup %4080  ;;  %v2503_v3 = vmul.f32 0.6931472, %v4079_v55  ;;  %v2550_v13 = vadd.f32 %v2518_v41, %v2294_v43  ;;  %v2293_v4 = vmax.f32 %v5363_v36, 0.0  ;;  %vm2508_vm15 = vcmp.lt.f32.partialorder %v2507_v52, 0.0004427343 }
 0x524   : > { %v2681_v23 = vmul.f32 %v4081_v33, %v5493_v7  ;;  %vm2682_vm0 = vcmp.eq.f32.partialorder %v5493_v7, inf  ;;  %v2685_v48 = vand.u32 2147483648, %v5493_v7  ;;  %v2522_v20 = vmul.f32 -0.5, %v5542_v53 }
 0x525   : > { %v2509_v61 = vsel %vm2508_vm15, %v2506_v8, %v2503_v3  ;;  %vm2684_vm1 = vcmp.eq.f32.partialorder %v5493_v7, 0.0  ;;  %v2566_v54 = vsel %vm2310_vm13, %v5338_v35, %v2550_v13  ;;  %vm2309_vm2 = vcmp.ne.f32.partialorder %v5363_v36, %v5363_v36 }
 0x526   : > { %v2683_v30 = vsel %vm2682_vm0, %v5493_v7, %v2681_v23  ;;  %v2549_v42 = vadd.f32 %v2509_v61, %v2293_v4  ;;  %v2584_v21 = vadd.f32 %v5011_v46, %v2566_v54  ;;  %v2532_v58 = vadd.f32 1.0, %v2531_v29 }
 0x527   : > { %v2686_v2 = vsel %vm2684_vm1, %v2685_v48, %v2683_v30  ;;  %v2534_v34 = vand.u32 2147483647, %v5517_v1  ;;  %v2523_v7 = vadd.f32 1.0, %v2522_v20  ;;  %v2525_v35 = vand.u32 2147483647, %v5542_v53 }
 0x528   : > { %v4083_v31 = vpop.eup %4082  ;;  %2726 = vst [vmem:[%s5231_s28 + $0x58] sm:$0xff] %v2686_v2  ;;  %v2565_v63 = vsel %vm2309_vm2, %v5363_v36, %v2549_v42  ;;  %4088 = vrsqrt.f32 %v2584_v21  ;;  %v2533_v0 = vmul.f32 %v5517_v1, %v2532_v58  ;;  %v2296_v49 = vmax.f32 %v5382_v28, 0.0 }
 0x529   : > { %v2583_v37 = vadd.f32 %v5011_v46, %v2565_v63  ;;  %v2530_v9 = vmul.f32 0.6931472, %v4083_v31  ;;  %vm2535_vm3 = vcmp.lt.f32.partialorder %v2534_v34, 0.0004427343  ;;  %v2295_v59 = vmax.f32 %v5394_v11, 0.0 }
 0x52a   : > { %v2524_v60 = vmul.f32 %v5542_v53, %v2523_v7  ;;  %vm2675_vm4 = vcmp.eq.f32.partialorder %v5560_v6, inf  ;;  %v2678_v40 = vand.u32 2147483648, %v5560_v6  ;;  %vm2526_vm5 = vcmp.lt.f32.partialorder %v2525_v35, 0.0004427343 }
 0x52b   : > { %v4085_v27 = vpop.eup %4084  ;;  %4090 = vrsqrt.f32 %v2583_v37  ;;  %v2536_v51 = vsel %vm2535_vm3, %v2533_v0, %v2530_v9  ;;  %vm2677_vm6 = vcmp.eq.f32.partialorder %v5560_v6, 0.0  ;;  %vm2312_vm7 = vcmp.ne.f32.partialorder %v5382_v28, %v5382_v28 }
 0x52c   : > { %v4087_v45 = vpop.eup %4086  ;;  %v2521_v5 = vmul.f32 0.6931472, %v4085_v27  ;;  %v2552_v32 = vadd.f32 %v2536_v51, %v2296_v49  ;;  %vm2311_vm8 = vcmp.ne.f32.partialorder %v5394_v11, %v5394_v11  ;;  %vm2696_vm9 = vcmp.eq.f32.partialorder %v2584_v21, inf }
 0x52d   : > { %v2674_v36 = vmul.f32 %v4087_v45, %v5560_v6  ;;  %v2699_v53 = vand.u32 2147483648, %v2584_v21  ;;  %vm2698_vm10 = vcmp.eq.f32.partialorder %v2584_v21, 0.0  ;;  %vm2689_vm11 = vcmp.eq.f32.partialorder %v2583_v37, inf }
 0x52e   : > { %v2527_v22 = vsel %vm2526_vm5, %v2524_v60, %v2521_v5  ;;  %v2568_v17 = vsel %vm2312_vm7, %v5382_v28, %v2552_v32  ;;  %v2692_v47 = vand.u32 2147483648, %v2583_v37  ;;  %vm2691_vm12 = vcmp.eq.f32.partialorder %v2583_v37, 0.0 }
 0x52f   : > { %v2676_v1 = vsel %vm2675_vm4, %v5560_v6, %v2674_v36  ;;  %v2551_v50 = vadd.f32 %v2527_v22, %v2295_v59  ;;  %v2586_v44 = vadd.f32 %v5011_v46, %v2568_v17 }
 0x530   : > { %v2679_v24 = vsel %vm2677_vm6, %v2678_v40, %v2676_v1 }
 0x531   : > { %2725 = vst [vmem:[%s5231_s28 + $0x50] sm:$0xff] %v2679_v24  ;;  %v2567_v18 = vsel %vm2311_vm8, %v5394_v11, %v2551_v50  ;;  %4092 = vrsqrt.f32 %v2586_v44  ;;  %vm2710_vm13 = vcmp.eq.f32.partialorder %v2586_v44, inf  ;;  %vm2712_vm14 = vcmp.eq.f32.partialorder %v2586_v44, 0.0 }
 0x532   : > { %v4089_v25 = vpop.eup %4088  ;;  %v2585_v14 = vadd.f32 %v5011_v46, %v2567_v18  ;;  %v2713_v46 = vand.u32 2147483648, %v2586_v44 }
 0x533   : > { %v2695_v39 = vmul.f32 %v4089_v25, %v2584_v21 }
 0x534   : > { %4094 = vrsqrt.f32 %v2585_v14  ;;  %vm2703_vm15 = vcmp.eq.f32.partialorder %v2585_v14, inf  ;;  %v2706_v52 = vand.u32 2147483648, %v2585_v14  ;;  %vm2705_vm0 = vcmp.eq.f32.partialorder %v2585_v14, 0.0 }
 0x535   : > { %v4091_v19 = vpop.eup %4090  ;;  %v2697_v28 = vsel %vm2696_vm9, %v2584_v21, %v2695_v39 }
 0x536   : > { %v2700_v12 = vsel %vm2698_vm10, %v2699_v53, %v2697_v28  ;;  %v2688_v15 = vmul.f32 %v4091_v19, %v2583_v37 }
 0x537   : > { %2728 = vst [vmem:[%s5231_s28 + $0x68] sm:$0xff] %v2700_v12 }
 0x538   : > { %v2690_v16 = vsel %vm2689_vm11, %v2583_v37, %v2688_v15 }
 0x539   : > { %v2693_v11 = vsel %vm2691_vm12, %v2692_v47, %v2690_v16 }
 0x53a   : > { %2727 = vst [vmem:[%s5231_s28 + $0x60] sm:$0xff] %v2693_v11 }
 0x53b   : > { %v4093_v38 = vpop.eup %4092 }
 0x53c   : > { %v2709_v57 = vmul.f32 %v4093_v38, %v2586_v44 }
 0x53e   : > { %v4095_v56 = vpop.eup %4094  ;;  %v2711_v10 = vsel %vm2710_vm13, %v2586_v44, %v2709_v57 }
 0x53f   : > { %v2714_v6 = vsel %vm2712_vm14, %v2713_v46, %v2711_v10  ;;  %v2702_v26 = vmul.f32 %v4095_v56, %v2585_v14 }
 0x540   : > { %2730 = vst [vmem:[%s5231_s28 + $0x78] sm:$0xff] %v2714_v6 }
 0x541   : > { %v2704_v55 = vsel %vm2703_vm15, %v2585_v14, %v2702_v26 }
 0x542   : > { %v2707_v62 = vsel %vm2705_vm0, %v2706_v52, %v2704_v55 }
 0x543   : > { %2729 = vst [vmem:[%s5231_s28 + $0x70] sm:$0xff] %v2707_v62 }
 0x544 PF: > { %s30_s30 = sadd.s32 1, %s4102_s30  }
 0x545   : > { %p27_p4 = scmp.ge.s32.totalorder %s30_s30, 4  }
 0x547   :  { %29 = sbr.rel (!%p27_p4) target bundleno = 9 (0x9), region = 138 }

</bundles_post_ra>
